<compile_context>
chip_gen: v7x
topology: tpu7x:2x2x1
jax: 0.10.0
libtpu: 0.0.40
codegen_flags: <defaults>
</compile_context>

<pallas_src>
import functools

import jax
import jax.numpy as jnp
from jax.experimental import pallas as pl
from jax.experimental.pallas import tpu as pltpu


def _tra_kernel(inv_tau,
                hist_ref, hidden_ref,
                w_ih_t_ref, w_hh_t_ref, bias_ref,
                w_hid_t_ref, b_hid_ref, w_fc_h_t_ref,
                gumbel_ref,
                pp_ref):
    T = hist_ref.shape[0]
    Bt = hist_ref.shape[1]          # batch tile
    S = hist_ref.shape[2]           # num_states
    H = w_hh_t_ref.shape[2]         # router hidden size

    hidden = hidden_ref[...]                                        # (Bt, D)

    # ---- fused hidden-side projection: [predictors | fc latent half] ----
    # w_hid_t = [w_p ; w_fc_latent].T, b_hid = [b_p ; b_fc]  (pre-built outside)
    hp = (jnp.dot(hidden, w_hid_t_ref[...],
                  preferred_element_type=jnp.float32)
          + b_hid_ref[...])                                          # (Bt, 2S)
    preds = hp[:, :S]                                                # (Bt, S)
    fc_latent = hp[:, S:]                                            # (Bt, S), b_fc folded in

    # ---- LSTM input projection hoisted out of the recurrence ------------
    # One matmul for all timesteps; bias (b_ih + b_hh) folded in.
    x2d = hist_ref[...].reshape(T * Bt, S)                           # (T*Bt, S)
    gx = (jnp.dot(x2d, w_ih_t_ref[...],
                  preferred_element_type=jnp.float32)
          + bias_ref[...])                                           # (T*Bt, 4H)
    # One-time gate split (outside the serial loop). PyTorch order: i, f, g, o.
    gx_i = gx[:, 0 * H:1 * H]
    gx_f = gx[:, 1 * H:2 * H]
    gx_g = gx[:, 2 * H:3 * H]
    gx_o = gx[:, 3 * H:4 * H]

    h = jnp.zeros((Bt, H), jnp.float32)
    c = jnp.zeros((Bt, H), jnp.float32)

    # Fully unrolled recurrence: T is small & static, so every slice below is a
    # static sublane slice and the LLO scheduler sees across iterations.
    for t in range(T):
        r0, r1 = t * Bt, (t + 1) * Bt
        i_g = jax.nn.sigmoid(
            gx_i[r0:r1] + jnp.dot(h, w_hh_t_ref[0],
                                  preferred_element_type=jnp.float32))
        f_g = jax.nn.sigmoid(
            gx_f[r0:r1] + jnp.dot(h, w_hh_t_ref[1],
                                  preferred_element_type=jnp.float32))
        g_g = jnp.tanh(
            gx_g[r0:r1] + jnp.dot(h, w_hh_t_ref[2],
                                  preferred_element_type=jnp.float32))
        o_g = jax.nn.sigmoid(
            gx_o[r0:r1] + jnp.dot(h, w_hh_t_ref[3],
                                  preferred_element_type=jnp.float32))
        c = f_g * c + i_g * g_g
        h = o_g * jnp.tanh(c)

    # ---- fc on concat([temporal_pred_error, latent_representation]) ----
    out = (jnp.dot(h, w_fc_h_t_ref[...],
                   preferred_element_type=jnp.float32)
           + fc_latent)                                              # (Bt, S)

    # ---- gumbel softmax (hard=False), 1/tau pre-inverted -----------------
    logits = (out + gumbel_ref[...]) * inv_tau
    logits = logits - jnp.max(logits, axis=-1, keepdims=True)
    e = jnp.exp(logits)
    denom = jnp.sum(e, axis=-1, keepdims=True)
    prob = e * pl.reciprocal(denom, approx=False)

    # Single lane-merged store: [preds | prob]. final_pred is computed outside.
    pp_ref[...] = jnp.concatenate([preds, prob], axis=-1)            # (Bt, 2S)


def tra_forward(hidden, hist_loss, params, gumbel, tau=1.0, block_b=None):
    """hidden: (B, D) f32; hist_loss: (B, T, S) f32; gumbel: (B, S) f32."""
    B, D = hidden.shape
    _, T, S = hist_loss.shape
    H = params["w_hh"].shape[1]

    # Batch tile: multiple of 8 (sublane) dividing B, else the whole batch.
    if block_b is None:
        block_b = B
        for cand in (128, 64, 32, 16, 8):
            if B % cand == 0:
                block_b = cand
                break
    assert B % block_b == 0

    # ---- weight prep (pre-transpose / pre-fuse / pre-sum biases) --------
    w_ih_t = params["w_ih"].T                                        # (S, 4H)
    w_hh = params["w_hh"]                                            # (4H, H)
    w_hh_t = jnp.stack([w_hh[k * H:(k + 1) * H].T for k in range(4)])  # (4, H, H)
    bias = (params["b_ih"] + params["b_hh"]).reshape(1, 4 * H)       # (1, 4H)
    w_fc = params["w_fc"]                                            # (S, H + D)
    w_fc_h_t = w_fc[:, :H].T                                         # (H, S)
    w_hid_t = jnp.concatenate([params["w_p"], w_fc[:, H:]], axis=0).T  # (D, 2S)
    b_hid = jnp.concatenate([params["b_p"], params["b_fc"]]).reshape(1, 2 * S)

    hist_tbs = jnp.transpose(hist_loss, (1, 0, 2))                   # (T, B, S)

    def full_spec(shape):
        return pl.BlockSpec(shape, lambda i: (0,) * len(shape))

    kernel = functools.partial(_tra_kernel, float(1.0 / tau))

    pp = pl.pallas_call(
        kernel,
        out_shape=jax.ShapeDtypeStruct((B, 2 * S), jnp.float32),
        grid=(B // block_b,),
        in_specs=[
            pl.BlockSpec((T, block_b, S), lambda i: (0, i, 0)),      # hist (time-major)
            pl.BlockSpec((block_b, D), lambda i: (i, 0)),            # hidden
            full_spec((S, 4 * H)),                                   # w_ih_t
            full_spec((4, H, H)),                                    # w_hh_t (per-gate)
            full_spec((1, 4 * H)),                                   # b_ih + b_hh
            full_spec((D, 2 * S)),                                   # [w_p; w_fc_latent].T
            full_spec((1, 2 * S)),                                   # [b_p; b_fc]
            full_spec((H, S)),                                       # w_fc_h.T
            pl.BlockSpec((block_b, S), lambda i: (i, 0)),            # gumbel
        ],
        out_specs=pl.BlockSpec((block_b, 2 * S), lambda i: (i, 0)),
        compiler_params=pltpu.CompilerParams(
            dimension_semantics=("parallel",)),
    )(hist_tbs, hidden, w_ih_t, w_hh_t, bias, w_hid_t, b_hid, w_fc_h_t, gumbel)

    preds = pp[:, :S]
    prob = pp[:, S:]
    # Cheap lane-wide reduction kept outside the kernel (avoids a 1-lane store).
    final = jnp.sum(preds * prob, axis=-1)
    return final, preds, prob


def tra_reference(hidden, hist_loss, params, gumbel, tau=1.0):
    """Pure-JAX reference mirroring the PyTorch forward (training mode)."""
    H = params["w_hh"].shape[1]
    preds = hidden @ params["w_p"].T + params["b_p"]

    def step(carry, x_t):
        h, c = carry
        gates = (x_t @ params["w_ih"].T + params["b_ih"]
                 + h @ params["w_hh"].T + params["b_hh"])
        i = jax.nn.sigmoid(gates[:, 0:H])
        f = jax.nn.sigmoid(gates[:, H:2 * H])
        g = jnp.tanh(gates[:, 2 * H:3 * H])
        o = jax.nn.sigmoid(gates[:, 3 * H:4 * H])
        c = f * c + i * g
        h = o * jnp.tanh(c)
        return (h, c), None

    B = hidden.shape[0]
    h0 = jnp.zeros((B, H), jnp.float32)
    c0 = jnp.zeros((B, H), jnp.float32)
    (h_last, _), _ = jax.lax.scan(step, (h0, c0),
                                  jnp.transpose(hist_loss, (1, 0, 2)))
    out = (jnp.concatenate([h_last, hidden], axis=-1) @ params["w_fc"].T
           + params["b_fc"])
    prob = jax.nn.softmax((out + gumbel) / tau, axis=-1)
    final = jnp.sum(preds * prob, axis=-1)
    return final, preds, prob


def init_params(key, input_size, num_states, hidden_size):
    ks = jax.random.split(key, 8)
    u = lambda k, shape, scale: jax.random.uniform(k, shape, jnp.float32, -scale, scale)
    lstm_s = 1.0 / (hidden_size ** 0.5)
    return {
        "w_ih": u(ks[0], (4 * hidden_size, num_states), lstm_s),
        "w_hh": u(ks[1], (4 * hidden_size, hidden_size), lstm_s),
        "b_ih": u(ks[2], (4 * hidden_size,), lstm_s),
        "b_hh": u(ks[3], (4 * hidden_size,), lstm_s),
        "w_p": u(ks[4], (num_states, input_size), 1.0 / (input_size ** 0.5)),
        "b_p": u(ks[5], (num_states,), 1.0 / (input_size ** 0.5)),
        "w_fc": u(ks[6], (num_states, hidden_size + input_size),
                  1.0 / ((hidden_size + input_size) ** 0.5)),
        "b_fc": u(ks[7], (num_states,), 1.0 / ((hidden_size + input_size) ** 0.5)),
    }


if __name__ == "__main__":
    B, T = 16, 8                # batch, history length
    INPUT_SIZE = 32             # RNN/Transformer hidden size
    NUM_STATES = 4              # latent trading patterns
    HIDDEN_SIZE = 8             # router LSTM hidden size
    TAU = 1.0

    key = jax.random.PRNGKey(0)
    k_h, k_l, k_p, k_g = jax.random.split(key, 4)

    hidden = jax.random.normal(k_h, (B, INPUT_SIZE), jnp.float32)
    hist_loss = jax.random.normal(k_l, (B, T, NUM_STATES), jnp.float32)
    params = init_params(k_p, INPUT_SIZE, NUM_STATES, HIDDEN_SIZE)

    # Deterministic Gumbel(0,1) noise (mirrors F.gumbel_softmax's sampling).
    # TODO(synk): eval-mode hard routing (argmax gather) path not implemented;
    # this kernel reproduces the training-mode weighted-sum routing.
    u = jax.random.uniform(k_g, (B, NUM_STATES), jnp.float32, 1e-10, 1.0)
    gumbel = -jnp.log(-jnp.log(u))

    final, preds, prob = tra_forward(hidden, hist_loss, params, gumbel,
                                     tau=TAU, block_b=8)
    jax.block_until_ready((final, preds, prob))

    # Cross-check against a pure-JAX reference of the PyTorch forward.
    final_r, preds_r, prob_r = tra_reference(hidden, hist_loss, params, gumbel, tau=TAU)
    assert jnp.allclose(final, final_r, atol=1e-5, rtol=1e-5)
    assert jnp.allclose(preds, preds_r, atol=1e-5, rtol=1e-5)
    assert jnp.allclose(prob, prob_r, atol=1e-5, rtol=1e-5)

    print("KERNEL_OK")
</pallas_src>

<mosaic_0001>
module attributes {stable_mosaic.version = 11 : i64} {
  func.func @_tra_kernel(%arg0: i32, %arg1: memref<8x8x4xf32, #tpu.memory_space<vmem>>, %arg2: memref<8x32xf32, #tpu.memory_space<vmem>>, %arg3: memref<4x32xf32, #tpu.memory_space<vmem>>, %arg4: memref<4x8x8xf32, #tpu.memory_space<vmem>>, %arg5: memref<1x32xf32, #tpu.memory_space<vmem>>, %arg6: memref<32x8xf32, #tpu.memory_space<vmem>>, %arg7: memref<1x8xf32, #tpu.memory_space<vmem>>, %arg8: memref<8x4xf32, #tpu.memory_space<vmem>>, %arg9: memref<8x4xf32, #tpu.memory_space<vmem>>, %arg10: memref<8x8xf32, #tpu.memory_space<vmem>>) attributes {dimension_semantics = [#tpu.dimension_semantics<parallel>], iteration_bounds = array<i64: 2>, scalar_prefetch = 0 : i64, scratch_operands = 0 : i64, tpu.core_type = #tpu.core_type<tc>, window_params = [{transform_indices = @transform_0, window_bounds = array<i64: 8, 8, 4>}, {transform_indices = @transform_1, window_bounds = array<i64: 8, 32>}, {pipeline_mode = #tpu.pipeline_mode<synchronous>, transform_indices = @transform_2, window_bounds = array<i64: 4, 32>}, {pipeline_mode = #tpu.pipeline_mode<synchronous>, transform_indices = @transform_3, window_bounds = array<i64: 4, 8, 8>}, {pipeline_mode = #tpu.pipeline_mode<synchronous>, transform_indices = @transform_4, window_bounds = array<i64: 1, 32>}, {pipeline_mode = #tpu.pipeline_mode<synchronous>, transform_indices = @transform_5, window_bounds = array<i64: 32, 8>}, {pipeline_mode = #tpu.pipeline_mode<synchronous>, transform_indices = @transform_6, window_bounds = array<i64: 1, 8>}, {pipeline_mode = #tpu.pipeline_mode<synchronous>, transform_indices = @transform_7, window_bounds = array<i64: 8, 4>}, {transform_indices = @transform_8, window_bounds = array<i64: 8, 4>}, {transform_indices = @transform_9, window_bounds = array<i64: 8, 8>}]} {
    %c0 = arith.constant 0 : index
    %c0_0 = arith.constant 0 : index
    %0 = vector.load %arg2[%c0, %c0_0] : memref<8x32xf32, #tpu.memory_space<vmem>>, vector<8x32xf32>
    %c0_1 = arith.constant 0 : index
    %c0_2 = arith.constant 0 : index
    %1 = vector.load %arg6[%c0_1, %c0_2] : memref<32x8xf32, #tpu.memory_space<vmem>>, vector<32x8xf32>
    %cst = arith.constant dense<0.000000e+00> : vector<8x8xf32>
    %2 = tpu.matmul %0, %1, %cst {dimension_numbers = #tpu.dot_dimension_numbers<[1], [0], [0], [1], [0, 0, 1, 1], [], []>} : vector<8x32xf32>, vector<32x8xf32>, vector<8x8xf32> -> vector<8x8xf32>
    %c0_3 = arith.constant 0 : index
    %c0_4 = arith.constant 0 : index
    %3 = vector.load %arg7[%c0_3, %c0_4] : memref<1x8xf32, #tpu.memory_space<vmem>>, vector<1x8xf32>
    %4 = vector.broadcast %3 : vector<1x8xf32> to vector<8x8xf32>
    %5 = arith.addf %2, %4 : vector<8x8xf32>
    %6 = vector.extract_strided_slice %5 {offsets = [0, 0], sizes = [8, 4], strides = [1, 1]} : vector<8x8xf32> to vector<8x4xf32>
    %7 = vector.extract_strided_slice %5 {offsets = [0, 4], sizes = [8, 4], strides = [1, 1]} : vector<8x8xf32> to vector<8x4xf32>
    %c0_5 = arith.constant 0 : index
    %c0_6 = arith.constant 0 : index
    %c0_7 = arith.constant 0 : index
    %8 = vector.load %arg1[%c0_5, %c0_6, %c0_7] : memref<8x8x4xf32, #tpu.memory_space<vmem>>, vector<8x8x4xf32>
    %9 = vector.shape_cast %8 : vector<8x8x4xf32> to vector<64x4xf32>
    %c0_8 = arith.constant 0 : index
    %c0_9 = arith.constant 0 : index
    %10 = vector.load %arg3[%c0_8, %c0_9] : memref<4x32xf32, #tpu.memory_space<vmem>>, vector<4x32xf32>
    %cst_10 = arith.constant dense<0.000000e+00> : vector<64x32xf32>
    %11 = tpu.matmul %9, %10, %cst_10 {dimension_numbers = #tpu.dot_dimension_numbers<[1], [0], [0], [1], [0, 0, 1, 1], [], []>} : vector<64x4xf32>, vector<4x32xf32>, vector<64x32xf32> -> vector<64x32xf32>
    %c0_11 = arith.constant 0 : index
    %c0_12 = arith.constant 0 : index
    %12 = vector.load %arg5[%c0_11, %c0_12] : memref<1x32xf32, #tpu.memory_space<vmem>>, vector<1x32xf32>
    %13 = vector.broadcast %12 : vector<1x32xf32> to vector<64x32xf32>
    %14 = arith.addf %11, %13 : vector<64x32xf32>
    %15 = vector.extract_strided_slice %14 {offsets = [0, 0], sizes = [64, 8], strides = [1, 1]} : vector<64x32xf32> to vector<64x8xf32>
    %16 = vector.extract_strided_slice %14 {offsets = [0, 8], sizes = [64, 8], strides = [1, 1]} : vector<64x32xf32> to vector<64x8xf32>
    %17 = vector.extract_strided_slice %14 {offsets = [0, 16], sizes = [64, 8], strides = [1, 1]} : vector<64x32xf32> to vector<64x8xf32>
    %18 = vector.extract_strided_slice %14 {offsets = [0, 24], sizes = [64, 8], strides = [1, 1]} : vector<64x32xf32> to vector<64x8xf32>
    %cst_13 = arith.constant 0.000000e+00 : f32
    %19 = vector.broadcast %cst_13 : f32 to vector<8x8xf32>
    %cst_14 = arith.constant 0.000000e+00 : f32
    %20 = vector.broadcast %cst_14 : f32 to vector<8x8xf32>
    %21 = vector.extract_strided_slice %15 {offsets = [0, 0], sizes = [8, 8], strides = [1, 1]} : vector<64x8xf32> to vector<8x8xf32>
    %c0_15 = arith.constant 0 : index
    %c0_16 = arith.constant 0 : index
    %c0_17 = arith.constant 0 : index
    %22 = vector.load %arg4[%c0_15, %c0_16, %c0_17] : memref<4x8x8xf32, #tpu.memory_space<vmem>>, vector<1x8x8xf32>
    %23 = vector.shape_cast %22 : vector<1x8x8xf32> to vector<8x8xf32>
    %cst_18 = arith.constant dense<0.000000e+00> : vector<8x8xf32>
    %24 = tpu.matmul %19, %23, %cst_18 {dimension_numbers = #tpu.dot_dimension_numbers<[1], [0], [0], [1], [0, 0, 1, 1], [], []>} : vector<8x8xf32>, vector<8x8xf32>, vector<8x8xf32> -> vector<8x8xf32>
    %25 = arith.addf %21, %24 : vector<8x8xf32>
    %26 = arith.negf %25 : vector<8x8xf32>
    %27 = math.exp %26 : vector<8x8xf32>
    %cst_19 = arith.constant 1.000000e+00 : f32
    %28 = vector.broadcast %cst_19 : f32 to vector<8x8xf32>
    %29 = arith.addf %28, %27 : vector<8x8xf32>
    %30 = arith.divf %28, %29 : vector<8x8xf32>
    %31 = vector.extract_strided_slice %16 {offsets = [0, 0], sizes = [8, 8], strides = [1, 1]} : vector<64x8xf32> to vector<8x8xf32>
    %c1 = arith.constant 1 : index
    %c0_20 = arith.constant 0 : index
    %c0_21 = arith.constant 0 : index
    %32 = vector.load %arg4[%c1, %c0_20, %c0_21] : memref<4x8x8xf32, #tpu.memory_space<vmem>>, vector<1x8x8xf32>
    %33 = vector.shape_cast %32 : vector<1x8x8xf32> to vector<8x8xf32>
    %cst_22 = arith.constant dense<0.000000e+00> : vector<8x8xf32>
    %34 = tpu.matmul %19, %33, %cst_22 {dimension_numbers = #tpu.dot_dimension_numbers<[1], [0], [0], [1], [0, 0, 1, 1], [], []>} : vector<8x8xf32>, vector<8x8xf32>, vector<8x8xf32> -> vector<8x8xf32>
    %35 = arith.addf %31, %34 : vector<8x8xf32>
    %36 = arith.negf %35 : vector<8x8xf32>
    %37 = math.exp %36 : vector<8x8xf32>
    %cst_23 = arith.constant 1.000000e+00 : f32
    %38 = vector.broadcast %cst_23 : f32 to vector<8x8xf32>
    %39 = arith.addf %38, %37 : vector<8x8xf32>
    %40 = arith.divf %38, %39 : vector<8x8xf32>
    %41 = vector.extract_strided_slice %17 {offsets = [0, 0], sizes = [8, 8], strides = [1, 1]} : vector<64x8xf32> to vector<8x8xf32>
    %c2 = arith.constant 2 : index
    %c0_24 = arith.constant 0 : index
    %c0_25 = arith.constant 0 : index
    %42 = vector.load %arg4[%c2, %c0_24, %c0_25] : memref<4x8x8xf32, #tpu.memory_space<vmem>>, vector<1x8x8xf32>
    %43 = vector.shape_cast %42 : vector<1x8x8xf32> to vector<8x8xf32>
    %cst_26 = arith.constant dense<0.000000e+00> : vector<8x8xf32>
    %44 = tpu.matmul %19, %43, %cst_26 {dimension_numbers = #tpu.dot_dimension_numbers<[1], [0], [0], [1], [0, 0, 1, 1], [], []>} : vector<8x8xf32>, vector<8x8xf32>, vector<8x8xf32> -> vector<8x8xf32>
    %45 = arith.addf %41, %44 : vector<8x8xf32>
    %46 = math.tanh %45 : vector<8x8xf32>
    %47 = vector.extract_strided_slice %18 {offsets = [0, 0], sizes = [8, 8], strides = [1, 1]} : vector<64x8xf32> to vector<8x8xf32>
    %c3 = arith.constant 3 : index
    %c0_27 = arith.constant 0 : index
    %c0_28 = arith.constant 0 : index
    %48 = vector.load %arg4[%c3, %c0_27, %c0_28] : memref<4x8x8xf32, #tpu.memory_space<vmem>>, vector<1x8x8xf32>
    %49 = vector.shape_cast %48 : vector<1x8x8xf32> to vector<8x8xf32>
    %cst_29 = arith.constant dense<0.000000e+00> : vector<8x8xf32>
    %50 = tpu.matmul %19, %49, %cst_29 {dimension_numbers = #tpu.dot_dimension_numbers<[1], [0], [0], [1], [0, 0, 1, 1], [], []>} : vector<8x8xf32>, vector<8x8xf32>, vector<8x8xf32> -> vector<8x8xf32>
    %51 = arith.addf %47, %50 : vector<8x8xf32>
    %52 = arith.negf %51 : vector<8x8xf32>
    %53 = math.exp %52 : vector<8x8xf32>
    %cst_30 = arith.constant 1.000000e+00 : f32
    %54 = vector.broadcast %cst_30 : f32 to vector<8x8xf32>
    %55 = arith.addf %54, %53 : vector<8x8xf32>
    %56 = arith.divf %54, %55 : vector<8x8xf32>
    %57 = arith.mulf %40, %20 : vector<8x8xf32>
    %58 = arith.mulf %30, %46 : vector<8x8xf32>
    %59 = arith.addf %57, %58 : vector<8x8xf32>
    %60 = math.tanh %59 : vector<8x8xf32>
    %61 = arith.mulf %56, %60 : vector<8x8xf32>
    %62 = vector.extract_strided_slice %15 {offsets = [8, 0], sizes = [8, 8], strides = [1, 1]} : vector<64x8xf32> to vector<8x8xf32>
    %c0_31 = arith.constant 0 : index
    %c0_32 = arith.constant 0 : index
    %c0_33 = arith.constant 0 : index
    %63 = vector.load %arg4[%c0_31, %c0_32, %c0_33] : memref<4x8x8xf32, #tpu.memory_space<vmem>>, vector<1x8x8xf32>
    %64 = vector.shape_cast %63 : vector<1x8x8xf32> to vector<8x8xf32>
    %cst_34 = arith.constant dense<0.000000e+00> : vector<8x8xf32>
    %65 = tpu.matmul %61, %64, %cst_34 {dimension_numbers = #tpu.dot_dimension_numbers<[1], [0], [0], [1], [0, 0, 1, 1], [], []>} : vector<8x8xf32>, vector<8x8xf32>, vector<8x8xf32> -> vector<8x8xf32>
    %66 = arith.addf %62, %65 : vector<8x8xf32>
    %67 = arith.negf %66 : vector<8x8xf32>
    %68 = math.exp %67 : vector<8x8xf32>
    %cst_35 = arith.constant 1.000000e+00 : f32
    %69 = vector.broadcast %cst_35 : f32 to vector<8x8xf32>
    %70 = arith.addf %69, %68 : vector<8x8xf32>
    %71 = arith.divf %69, %70 : vector<8x8xf32>
    %72 = vector.extract_strided_slice %16 {offsets = [8, 0], sizes = [8, 8], strides = [1, 1]} : vector<64x8xf32> to vector<8x8xf32>
    %c1_36 = arith.constant 1 : index
    %c0_37 = arith.constant 0 : index
    %c0_38 = arith.constant 0 : index
    %73 = vector.load %arg4[%c1_36, %c0_37, %c0_38] : memref<4x8x8xf32, #tpu.memory_space<vmem>>, vector<1x8x8xf32>
    %74 = vector.shape_cast %73 : vector<1x8x8xf32> to vector<8x8xf32>
    %cst_39 = arith.constant dense<0.000000e+00> : vector<8x8xf32>
    %75 = tpu.matmul %61, %74, %cst_39 {dimension_numbers = #tpu.dot_dimension_numbers<[1], [0], [0], [1], [0, 0, 1, 1], [], []>} : vector<8x8xf32>, vector<8x8xf32>, vector<8x8xf32> -> vector<8x8xf32>
    %76 = arith.addf %72, %75 : vector<8x8xf32>
    %77 = arith.negf %76 : vector<8x8xf32>
    %78 = math.exp %77 : vector<8x8xf32>
    %cst_40 = arith.constant 1.000000e+00 : f32
    %79 = vector.broadcast %cst_40 : f32 to vector<8x8xf32>
    %80 = arith.addf %79, %78 : vector<8x8xf32>
    %81 = arith.divf %79, %80 : vector<8x8xf32>
    %82 = vector.extract_strided_slice %17 {offsets = [8, 0], sizes = [8, 8], strides = [1, 1]} : vector<64x8xf32> to vector<8x8xf32>
    %c2_41 = arith.constant 2 : index
    %c0_42 = arith.constant 0 : index
    %c0_43 = arith.constant 0 : index
    %83 = vector.load %arg4[%c2_41, %c0_42, %c0_43] : memref<4x8x8xf32, #tpu.memory_space<vmem>>, vector<1x8x8xf32>
    %84 = vector.shape_cast %83 : vector<1x8x8xf32> to vector<8x8xf32>
    %cst_44 = arith.constant dense<0.000000e+00> : vector<8x8xf32>
    %85 = tpu.matmul %61, %84, %cst_44 {dimension_numbers = #tpu.dot_dimension_numbers<[1], [0], [0], [1], [0, 0, 1, 1], [], []>} : vector<8x8xf32>, vector<8x8xf32>, vector<8x8xf32> -> vector<8x8xf32>
    %86 = arith.addf %82, %85 : vector<8x8xf32>
    %87 = math.tanh %86 : vector<8x8xf32>
    %88 = vector.extract_strided_slice %18 {offsets = [8, 0], sizes = [8, 8], strides = [1, 1]} : vector<64x8xf32> to vector<8x8xf32>
    %c3_45 = arith.constant 3 : index
    %c0_46 = arith.constant 0 : index
    %c0_47 = arith.constant 0 : index
    %89 = vector.load %arg4[%c3_45, %c0_46, %c0_47] : memref<4x8x8xf32, #tpu.memory_space<vmem>>, vector<1x8x8xf32>
    %90 = vector.shape_cast %89 : vector<1x8x8xf32> to vector<8x8xf32>
    %cst_48 = arith.constant dense<0.000000e+00> : vector<8x8xf32>
    %91 = tpu.matmul %61, %90, %cst_48 {dimension_numbers = #tpu.dot_dimension_numbers<[1], [0], [0], [1], [0, 0, 1, 1], [], []>} : vector<8x8xf32>, vector<8x8xf32>, vector<8x8xf32> -> vector<8x8xf32>
    %92 = arith.addf %88, %91 : vector<8x8xf32>
    %93 = arith.negf %92 : vector<8x8xf32>
    %94 = math.exp %93 : vector<8x8xf32>
    %cst_49 = arith.constant 1.000000e+00 : f32
    %95 = vector.broadcast %cst_49 : f32 to vector<8x8xf32>
    %96 = arith.addf %95, %94 : vector<8x8xf32>
    %97 = arith.divf %95, %96 : vector<8x8xf32>
    %98 = arith.mulf %81, %59 : vector<8x8xf32>
    %99 = arith.mulf %71, %87 : vector<8x8xf32>
    %100 = arith.addf %98, %99 : vector<8x8xf32>
    %101 = math.tanh %100 : vector<8x8xf32>
    %102 = arith.mulf %97, %101 : vector<8x8xf32>
    %103 = vector.extract_strided_slice %15 {offsets = [16, 0], sizes = [8, 8], strides = [1, 1]} : vector<64x8xf32> to vector<8x8xf32>
    %c0_50 = arith.constant 0 : index
    %c0_51 = arith.constant 0 : index
    %c0_52 = arith.constant 0 : index
    %104 = vector.load %arg4[%c0_50, %c0_51, %c0_52] : memref<4x8x8xf32, #tpu.memory_space<vmem>>, vector<1x8x8xf32>
    %105 = vector.shape_cast %104 : vector<1x8x8xf32> to vector<8x8xf32>
    %cst_53 = arith.constant dense<0.000000e+00> : vector<8x8xf32>
    %106 = tpu.matmul %102, %105, %cst_53 {dimension_numbers = #tpu.dot_dimension_numbers<[1], [0], [0], [1], [0, 0, 1, 1], [], []>} : vector<8x8xf32>, vector<8x8xf32>, vector<8x8xf32> -> vector<8x8xf32>
    %107 = arith.addf %103, %106 : vector<8x8xf32>
    %108 = arith.negf %107 : vector<8x8xf32>
    %109 = math.exp %108 : vector<8x8xf32>
    %cst_54 = arith.constant 1.000000e+00 : f32
    %110 = vector.broadcast %cst_54 : f32 to vector<8x8xf32>
    %111 = arith.addf %110, %109 : vector<8x8xf32>
    %112 = arith.divf %110, %111 : vector<8x8xf32>
    %113 = vector.extract_strided_slice %16 {offsets = [16, 0], sizes = [8, 8], strides = [1, 1]} : vector<64x8xf32> to vector<8x8xf32>
    %c1_55 = arith.constant 1 : index
    %c0_56 = arith.constant 0 : index
    %c0_57 = arith.constant 0 : index
    %114 = vector.load %arg4[%c1_55, %c0_56, %c0_57] : memref<4x8x8xf32, #tpu.memory_space<vmem>>, vector<1x8x8xf32>
    %115 = vector.shape_cast %114 : vector<1x8x8xf32> to vector<8x8xf32>
    %cst_58 = arith.constant dense<0.000000e+00> : vector<8x8xf32>
    %116 = tpu.matmul %102, %115, %cst_58 {dimension_numbers = #tpu.dot_dimension_numbers<[1], [0], [0], [1], [0, 0, 1, 1], [], []>} : vector<8x8xf32>, vector<8x8xf32>, vector<8x8xf32> -> vector<8x8xf32>
    %117 = arith.addf %113, %116 : vector<8x8xf32>
    %118 = arith.negf %117 : vector<8x8xf32>
    %119 = math.exp %118 : vector<8x8xf32>
    %cst_59 = arith.constant 1.000000e+00 : f32
    %120 = vector.broadcast %cst_59 : f32 to vector<8x8xf32>
    %121 = arith.addf %120, %119 : vector<8x8xf32>
    %122 = arith.divf %120, %121 : vector<8x8xf32>
    %123 = vector.extract_strided_slice %17 {offsets = [16, 0], sizes = [8, 8], strides = [1, 1]} : vector<64x8xf32> to vector<8x8xf32>
    %c2_60 = arith.constant 2 : index
    %c0_61 = arith.constant 0 : index
    %c0_62 = arith.constant 0 : index
    %124 = vector.load %arg4[%c2_60, %c0_61, %c0_62] : memref<4x8x8xf32, #tpu.memory_space<vmem>>, vector<1x8x8xf32>
    %125 = vector.shape_cast %124 : vector<1x8x8xf32> to vector<8x8xf32>
    %cst_63 = arith.constant dense<0.000000e+00> : vector<8x8xf32>
    %126 = tpu.matmul %102, %125, %cst_63 {dimension_numbers = #tpu.dot_dimension_numbers<[1], [0], [0], [1], [0, 0, 1, 1], [], []>} : vector<8x8xf32>, vector<8x8xf32>, vector<8x8xf32> -> vector<8x8xf32>
    %127 = arith.addf %123, %126 : vector<8x8xf32>
    %128 = math.tanh %127 : vector<8x8xf32>
    %129 = vector.extract_strided_slice %18 {offsets = [16, 0], sizes = [8, 8], strides = [1, 1]} : vector<64x8xf32> to vector<8x8xf32>
    %c3_64 = arith.constant 3 : index
    %c0_65 = arith.constant 0 : index
    %c0_66 = arith.constant 0 : index
    %130 = vector.load %arg4[%c3_64, %c0_65, %c0_66] : memref<4x8x8xf32, #tpu.memory_space<vmem>>, vector<1x8x8xf32>
    %131 = vector.shape_cast %130 : vector<1x8x8xf32> to vector<8x8xf32>
    %cst_67 = arith.constant dense<0.000000e+00> : vector<8x8xf32>
    %132 = tpu.matmul %102, %131, %cst_67 {dimension_numbers = #tpu.dot_dimension_numbers<[1], [0], [0], [1], [0, 0, 1, 1], [], []>} : vector<8x8xf32>, vector<8x8xf32>, vector<8x8xf32> -> vector<8x8xf32>
    %133 = arith.addf %129, %132 : vector<8x8xf32>
    %134 = arith.negf %133 : vector<8x8xf32>
    %135 = math.exp %134 : vector<8x8xf32>
    %cst_68 = arith.constant 1.000000e+00 : f32
    %136 = vector.broadcast %cst_68 : f32 to vector<8x8xf32>
    %137 = arith.addf %136, %135 : vector<8x8xf32>
    %138 = arith.divf %136, %137 : vector<8x8xf32>
    %139 = arith.mulf %122, %100 : vector<8x8xf32>
    %140 = arith.mulf %112, %128 : vector<8x8xf32>
    %141 = arith.addf %139, %140 : vector<8x8xf32>
    %142 = math.tanh %141 : vector<8x8xf32>
    %143 = arith.mulf %138, %142 : vector<8x8xf32>
    %144 = vector.extract_strided_slice %15 {offsets = [24, 0], sizes = [8, 8], strides = [1, 1]} : vector<64x8xf32> to vector<8x8xf32>
    %c0_69 = arith.constant 0 : index
    %c0_70 = arith.constant 0 : index
    %c0_71 = arith.constant 0 : index
    %145 = vector.load %arg4[%c0_69, %c0_70, %c0_71] : memref<4x8x8xf32, #tpu.memory_space<vmem>>, vector<1x8x8xf32>
    %146 = vector.shape_cast %145 : vector<1x8x8xf32> to vector<8x8xf32>
    %cst_72 = arith.constant dense<0.000000e+00> : vector<8x8xf32>
    %147 = tpu.matmul %143, %146, %cst_72 {dimension_numbers = #tpu.dot_dimension_numbers<[1], [0], [0], [1], [0, 0, 1, 1], [], []>} : vector<8x8xf32>, vector<8x8xf32>, vector<8x8xf32> -> vector<8x8xf32>
    %148 = arith.addf %144, %147 : vector<8x8xf32>
    %149 = arith.negf %148 : vector<8x8xf32>
    %150 = math.exp %149 : vector<8x8xf32>
    %cst_73 = arith.constant 1.000000e+00 : f32
    %151 = vector.broadcast %cst_73 : f32 to vector<8x8xf32>
    %152 = arith.addf %151, %150 : vector<8x8xf32>
    %153 = arith.divf %151, %152 : vector<8x8xf32>
    %154 = vector.extract_strided_slice %16 {offsets = [24, 0], sizes = [8, 8], strides = [1, 1]} : vector<64x8xf32> to vector<8x8xf32>
    %c1_74 = arith.constant 1 : index
    %c0_75 = arith.constant 0 : index
    %c0_76 = arith.constant 0 : index
    %155 = vector.load %arg4[%c1_74, %c0_75, %c0_76] : memref<4x8x8xf32, #tpu.memory_space<vmem>>, vector<1x8x8xf32>
    %156 = vector.shape_cast %155 : vector<1x8x8xf32> to vector<8x8xf32>
    %cst_77 = arith.constant dense<0.000000e+00> : vector<8x8xf32>
    %157 = tpu.matmul %143, %156, %cst_77 {dimension_numbers = #tpu.dot_dimension_numbers<[1], [0], [0], [1], [0, 0, 1, 1], [], []>} : vector<8x8xf32>, vector<8x8xf32>, vector<8x8xf32> -> vector<8x8xf32>
    %158 = arith.addf %154, %157 : vector<8x8xf32>
    %159 = arith.negf %158 : vector<8x8xf32>
    %160 = math.exp %159 : vector<8x8xf32>
    %cst_78 = arith.constant 1.000000e+00 : f32
    %161 = vector.broadcast %cst_78 : f32 to vector<8x8xf32>
    %162 = arith.addf %161, %160 : vector<8x8xf32>
    %163 = arith.divf %161, %162 : vector<8x8xf32>
    %164 = vector.extract_strided_slice %17 {offsets = [24, 0], sizes = [8, 8], strides = [1, 1]} : vector<64x8xf32> to vector<8x8xf32>
    %c2_79 = arith.constant 2 : index
    %c0_80 = arith.constant 0 : index
    %c0_81 = arith.constant 0 : index
    %165 = vector.load %arg4[%c2_79, %c0_80, %c0_81] : memref<4x8x8xf32, #tpu.memory_space<vmem>>, vector<1x8x8xf32>
    %166 = vector.shape_cast %165 : vector<1x8x8xf32> to vector<8x8xf32>
    %cst_82 = arith.constant dense<0.000000e+00> : vector<8x8xf32>
    %167 = tpu.matmul %143, %166, %cst_82 {dimension_numbers = #tpu.dot_dimension_numbers<[1], [0], [0], [1], [0, 0, 1, 1], [], []>} : vector<8x8xf32>, vector<8x8xf32>, vector<8x8xf32> -> vector<8x8xf32>
    %168 = arith.addf %164, %167 : vector<8x8xf32>
    %169 = math.tanh %168 : vector<8x8xf32>
    %170 = vector.extract_strided_slice %18 {offsets = [24, 0], sizes = [8, 8], strides = [1, 1]} : vector<64x8xf32> to vector<8x8xf32>
    %c3_83 = arith.constant 3 : index
    %c0_84 = arith.constant 0 : index
    %c0_85 = arith.constant 0 : index
    %171 = vector.load %arg4[%c3_83, %c0_84, %c0_85] : memref<4x8x8xf32, #tpu.memory_space<vmem>>, vector<1x8x8xf32>
    %172 = vector.shape_cast %171 : vector<1x8x8xf32> to vector<8x8xf32>
    %cst_86 = arith.constant dense<0.000000e+00> : vector<8x8xf32>
    %173 = tpu.matmul %143, %172, %cst_86 {dimension_numbers = #tpu.dot_dimension_numbers<[1], [0], [0], [1], [0, 0, 1, 1], [], []>} : vector<8x8xf32>, vector<8x8xf32>, vector<8x8xf32> -> vector<8x8xf32>
    %174 = arith.addf %170, %173 : vector<8x8xf32>
    %175 = arith.negf %174 : vector<8x8xf32>
    %176 = math.exp %175 : vector<8x8xf32>
    %cst_87 = arith.constant 1.000000e+00 : f32
    %177 = vector.broadcast %cst_87 : f32 to vector<8x8xf32>
    %178 = arith.addf %177, %176 : vector<8x8xf32>
    %179 = arith.divf %177, %178 : vector<8x8xf32>
    %180 = arith.mulf %163, %141 : vector<8x8xf32>
    %181 = arith.mulf %153, %169 : vector<8x8xf32>
    %182 = arith.addf %180, %181 : vector<8x8xf32>
    %183 = math.tanh %182 : vector<8x8xf32>
    %184 = arith.mulf %179, %183 : vector<8x8xf32>
    %185 = vector.extract_strided_slice %15 {offsets = [32, 0], sizes = [8, 8], strides = [1, 1]} : vector<64x8xf32> to vector<8x8xf32>
    %c0_88 = arith.constant 0 : index
    %c0_89 = arith.constant 0 : index
    %c0_90 = arith.constant 0 : index
    %186 = vector.load %arg4[%c0_88, %c0_89, %c0_90] : memref<4x8x8xf32, #tpu.memory_space<vmem>>, vector<1x8x8xf32>
    %187 = vector.shape_cast %186 : vector<1x8x8xf32> to vector<8x8xf32>
    %cst_91 = arith.constant dense<0.000000e+00> : vector<8x8xf32>
    %188 = tpu.matmul %184, %187, %cst_91 {dimension_numbers = #tpu.dot_dimension_numbers<[1], [0], [0], [1], [0, 0, 1, 1], [], []>} : vector<8x8xf32>, vector<8x8xf32>, vector<8x8xf32> -> vector<8x8xf32>
    %189 = arith.addf %185, %188 : vector<8x8xf32>
    %190 = arith.negf %189 : vector<8x8xf32>
    %191 = math.exp %190 : vector<8x8xf32>
    %cst_92 = arith.constant 1.000000e+00 : f32
    %192 = vector.broadcast %cst_92 : f32 to vector<8x8xf32>
    %193 = arith.addf %192, %191 : vector<8x8xf32>
    %194 = arith.divf %192, %193 : vector<8x8xf32>
    %195 = vector.extract_strided_slice %16 {offsets = [32, 0], sizes = [8, 8], strides = [1, 1]} : vector<64x8xf32> to vector<8x8xf32>
    %c1_93 = arith.constant 1 : index
    %c0_94 = arith.constant 0 : index
    %c0_95 = arith.constant 0 : index
    %196 = vector.load %arg4[%c1_93, %c0_94, %c0_95] : memref<4x8x8xf32, #tpu.memory_space<vmem>>, vector<1x8x8xf32>
    %197 = vector.shape_cast %196 : vector<1x8x8xf32> to vector<8x8xf32>
    %cst_96 = arith.constant dense<0.000000e+00> : vector<8x8xf32>
    %198 = tpu.matmul %184, %197, %cst_96 {dimension_numbers = #tpu.dot_dimension_numbers<[1], [0], [0], [1], [0, 0, 1, 1], [], []>} : vector<8x8xf32>, vector<8x8xf32>, vector<8x8xf32> -> vector<8x8xf32>
    %199 = arith.addf %195, %198 : vector<8x8xf32>
    %200 = arith.negf %199 : vector<8x8xf32>
    %201 = math.exp %200 : vector<8x8xf32>
    %cst_97 = arith.constant 1.000000e+00 : f32
    %202 = vector.broadcast %cst_97 : f32 to vector<8x8xf32>
    %203 = arith.addf %202, %201 : vector<8x8xf32>
    %204 = arith.divf %202, %203 : vector<8x8xf32>
    %205 = vector.extract_strided_slice %17 {offsets = [32, 0], sizes = [8, 8], strides = [1, 1]} : vector<64x8xf32> to vector<8x8xf32>
    %c2_98 = arith.constant 2 : index
    %c0_99 = arith.constant 0 : index
    %c0_100 = arith.constant 0 : index
    %206 = vector.load %arg4[%c2_98, %c0_99, %c0_100] : memref<4x8x8xf32, #tpu.memory_space<vmem>>, vector<1x8x8xf32>
    %207 = vector.shape_cast %206 : vector<1x8x8xf32> to vector<8x8xf32>
    %cst_101 = arith.constant dense<0.000000e+00> : vector<8x8xf32>
    %208 = tpu.matmul %184, %207, %cst_101 {dimension_numbers = #tpu.dot_dimension_numbers<[1], [0], [0], [1], [0, 0, 1, 1], [], []>} : vector<8x8xf32>, vector<8x8xf32>, vector<8x8xf32> -> vector<8x8xf32>
    %209 = arith.addf %205, %208 : vector<8x8xf32>
    %210 = math.tanh %209 : vector<8x8xf32>
    %211 = vector.extract_strided_slice %18 {offsets = [32, 0], sizes = [8, 8], strides = [1, 1]} : vector<64x8xf32> to vector<8x8xf32>
    %c3_102 = arith.constant 3 : index
    %c0_103 = arith.constant 0 : index
    %c0_104 = arith.constant 0 : index
    %212 = vector.load %arg4[%c3_102, %c0_103, %c0_104] : memref<4x8x8xf32, #tpu.memory_space<vmem>>, vector<1x8x8xf32>
    %213 = vector.shape_cast %212 : vector<1x8x8xf32> to vector<8x8xf32>
    %cst_105 = arith.constant dense<0.000000e+00> : vector<8x8xf32>
    %214 = tpu.matmul %184, %213, %cst_105 {dimension_numbers = #tpu.dot_dimension_numbers<[1], [0], [0], [1], [0, 0, 1, 1], [], []>} : vector<8x8xf32>, vector<8x8xf32>, vector<8x8xf32> -> vector<8x8xf32>
    %215 = arith.addf %211, %214 : vector<8x8xf32>
    %216 = arith.negf %215 : vector<8x8xf32>
    %217 = math.exp %216 : vector<8x8xf32>
    %cst_106 = arith.constant 1.000000e+00 : f32
    %218 = vector.broadcast %cst_106 : f32 to vector<8x8xf32>
    %219 = arith.addf %218, %217 : vector<8x8xf32>
    %220 = arith.divf %218, %219 : vector<8x8xf32>
    %221 = arith.mulf %204, %182 : vector<8x8xf32>
    %222 = arith.mulf %194, %210 : vector<8x8xf32>
    %223 = arith.addf %221, %222 : vector<8x8xf32>
    %224 = math.tanh %223 : vector<8x8xf32>
    %225 = arith.mulf %220, %224 : vector<8x8xf32>
    %226 = vector.extract_strided_slice %15 {offsets = [40, 0], sizes = [8, 8], strides = [1, 1]} : vector<64x8xf32> to vector<8x8xf32>
    %c0_107 = arith.constant 0 : index
    %c0_108 = arith.constant 0 : index
    %c0_109 = arith.constant 0 : index
    %227 = vector.load %arg4[%c0_107, %c0_108, %c0_109] : memref<4x8x8xf32, #tpu.memory_space<vmem>>, vector<1x8x8xf32>
    %228 = vector.shape_cast %227 : vector<1x8x8xf32> to vector<8x8xf32>
    %cst_110 = arith.constant dense<0.000000e+00> : vector<8x8xf32>
    %229 = tpu.matmul %225, %228, %cst_110 {dimension_numbers = #tpu.dot_dimension_numbers<[1], [0], [0], [1], [0, 0, 1, 1], [], []>} : vector<8x8xf32>, vector<8x8xf32>, vector<8x8xf32> -> vector<8x8xf32>
    %230 = arith.addf %226, %229 : vector<8x8xf32>
    %231 = arith.negf %230 : vector<8x8xf32>
    %232 = math.exp %231 : vector<8x8xf32>
    %cst_111 = arith.constant 1.000000e+00 : f32
    %233 = vector.broadcast %cst_111 : f32 to vector<8x8xf32>
    %234 = arith.addf %233, %232 : vector<8x8xf32>
    %235 = arith.divf %233, %234 : vector<8x8xf32>
    %236 = vector.extract_strided_slice %16 {offsets = [40, 0], sizes = [8, 8], strides = [1, 1]} : vector<64x8xf32> to vector<8x8xf32>
    %c1_112 = arith.constant 1 : index
    %c0_113 = arith.constant 0 : index
    %c0_114 = arith.constant 0 : index
    %237 = vector.load %arg4[%c1_112, %c0_113, %c0_114] : memref<4x8x8xf32, #tpu.memory_space<vmem>>, vector<1x8x8xf32>
    %238 = vector.shape_cast %237 : vector<1x8x8xf32> to vector<8x8xf32>
    %cst_115 = arith.constant dense<0.000000e+00> : vector<8x8xf32>
    %239 = tpu.matmul %225, %238, %cst_115 {dimension_numbers = #tpu.dot_dimension_numbers<[1], [0], [0], [1], [0, 0, 1, 1], [], []>} : vector<8x8xf32>, vector<8x8xf32>, vector<8x8xf32> -> vector<8x8xf32>
    %240 = arith.addf %236, %239 : vector<8x8xf32>
    %241 = arith.negf %240 : vector<8x8xf32>
    %242 = math.exp %241 : vector<8x8xf32>
    %cst_116 = arith.constant 1.000000e+00 : f32
    %243 = vector.broadcast %cst_116 : f32 to vector<8x8xf32>
    %244 = arith.addf %243, %242 : vector<8x8xf32>
    %245 = arith.divf %243, %244 : vector<8x8xf32>
    %246 = vector.extract_strided_slice %17 {offsets = [40, 0], sizes = [8, 8], strides = [1, 1]} : vector<64x8xf32> to vector<8x8xf32>
    %c2_117 = arith.constant 2 : index
    %c0_118 = arith.constant 0 : index
    %c0_119 = arith.constant 0 : index
    %247 = vector.load %arg4[%c2_117, %c0_118, %c0_119] : memref<4x8x8xf32, #tpu.memory_space<vmem>>, vector<1x8x8xf32>
    %248 = vector.shape_cast %247 : vector<1x8x8xf32> to vector<8x8xf32>
    %cst_120 = arith.constant dense<0.000000e+00> : vector<8x8xf32>
    %249 = tpu.matmul %225, %248, %cst_120 {dimension_numbers = #tpu.dot_dimension_numbers<[1], [0], [0], [1], [0, 0, 1, 1], [], []>} : vector<8x8xf32>, vector<8x8xf32>, vector<8x8xf32> -> vector<8x8xf32>
    %250 = arith.addf %246, %249 : vector<8x8xf32>
    %251 = math.tanh %250 : vector<8x8xf32>
    %252 = vector.extract_strided_slice %18 {offsets = [40, 0], sizes = [8, 8], strides = [1, 1]} : vector<64x8xf32> to vector<8x8xf32>
    %c3_121 = arith.constant 3 : index
    %c0_122 = arith.constant 0 : index
    %c0_123 = arith.constant 0 : index
    %253 = vector.load %arg4[%c3_121, %c0_122, %c0_123] : memref<4x8x8xf32, #tpu.memory_space<vmem>>, vector<1x8x8xf32>
    %254 = vector.shape_cast %253 : vector<1x8x8xf32> to vector<8x8xf32>
    %cst_124 = arith.constant dense<0.000000e+00> : vector<8x8xf32>
    %255 = tpu.matmul %225, %254, %cst_124 {dimension_numbers = #tpu.dot_dimension_numbers<[1], [0], [0], [1], [0, 0, 1, 1], [], []>} : vector<8x8xf32>, vector<8x8xf32>, vector<8x8xf32> -> vector<8x8xf32>
    %256 = arith.addf %252, %255 : vector<8x8xf32>
    %257 = arith.negf %256 : vector<8x8xf32>
    %258 = math.exp %257 : vector<8x8xf32>
    %cst_125 = arith.constant 1.000000e+00 : f32
    %259 = vector.broadcast %cst_125 : f32 to vector<8x8xf32>
    %260 = arith.addf %259, %258 : vector<8x8xf32>
    %261 = arith.divf %259, %260 : vector<8x8xf32>
    %262 = arith.mulf %245, %223 : vector<8x8xf32>
    %263 = arith.mulf %235, %251 : vector<8x8xf32>
    %264 = arith.addf %262, %263 : vector<8x8xf32>
    %265 = math.tanh %264 : vector<8x8xf32>
    %266 = arith.mulf %261, %265 : vector<8x8xf32>
    %267 = vector.extract_strided_slice %15 {offsets = [48, 0], sizes = [8, 8], strides = [1, 1]} : vector<64x8xf32> to vector<8x8xf32>
    %c0_126 = arith.constant 0 : index
    %c0_127 = arith.constant 0 : index
    %c0_128 = arith.constant 0 : index
    %268 = vector.load %arg4[%c0_126, %c0_127, %c0_128] : memref<4x8x8xf32, #tpu.memory_space<vmem>>, vector<1x8x8xf32>
    %269 = vector.shape_cast %268 : vector<1x8x8xf32> to vector<8x8xf32>
    %cst_129 = arith.constant dense<0.000000e+00> : vector<8x8xf32>
    %270 = tpu.matmul %266, %269, %cst_129 {dimension_numbers = #tpu.dot_dimension_numbers<[1], [0], [0], [1], [0, 0, 1, 1], [], []>} : vector<8x8xf32>, vector<8x8xf32>, vector<8x8xf32> -> vector<8x8xf32>
    %271 = arith.addf %267, %270 : vector<8x8xf32>
    %272 = arith.negf %271 : vector<8x8xf32>
    %273 = math.exp %272 : vector<8x8xf32>
    %cst_130 = arith.constant 1.000000e+00 : f32
    %274 = vector.broadcast %cst_130 : f32 to vector<8x8xf32>
    %275 = arith.addf %274, %273 : vector<8x8xf32>
    %276 = arith.divf %274, %275 : vector<8x8xf32>
    %277 = vector.extract_strided_slice %16 {offsets = [48, 0], sizes = [8, 8], strides = [1, 1]} : vector<64x8xf32> to vector<8x8xf32>
    %c1_131 = arith.constant 1 : index
    %c0_132 = arith.constant 0 : index
    %c0_133 = arith.constant 0 : index
    %278 = vector.load %arg4[%c1_131, %c0_132, %c0_133] : memref<4x8x8xf32, #tpu.memory_space<vmem>>, vector<1x8x8xf32>
    %279 = vector.shape_cast %278 : vector<1x8x8xf32> to vector<8x8xf32>
    %cst_134 = arith.constant dense<0.000000e+00> : vector<8x8xf32>
    %280 = tpu.matmul %266, %279, %cst_134 {dimension_numbers = #tpu.dot_dimension_numbers<[1], [0], [0], [1], [0, 0, 1, 1], [], []>} : vector<8x8xf32>, vector<8x8xf32>, vector<8x8xf32> -> vector<8x8xf32>
    %281 = arith.addf %277, %280 : vector<8x8xf32>
    %282 = arith.negf %281 : vector<8x8xf32>
    %283 = math.exp %282 : vector<8x8xf32>
    %cst_135 = arith.constant 1.000000e+00 : f32
    %284 = vector.broadcast %cst_135 : f32 to vector<8x8xf32>
    %285 = arith.addf %284, %283 : vector<8x8xf32>
    %286 = arith.divf %284, %285 : vector<8x8xf32>
    %287 = vector.extract_strided_slice %17 {offsets = [48, 0], sizes = [8, 8], strides = [1, 1]} : vector<64x8xf32> to vector<8x8xf32>
    %c2_136 = arith.constant 2 : index
    %c0_137 = arith.constant 0 : index
    %c0_138 = arith.constant 0 : index
    %288 = vector.load %arg4[%c2_136, %c0_137, %c0_138] : memref<4x8x8xf32, #tpu.memory_space<vmem>>, vector<1x8x8xf32>
    %289 = vector.shape_cast %288 : vector<1x8x8xf32> to vector<8x8xf32>
    %cst_139 = arith.constant dense<0.000000e+00> : vector<8x8xf32>
    %290 = tpu.matmul %266, %289, %cst_139 {dimension_numbers = #tpu.dot_dimension_numbers<[1], [0], [0], [1], [0, 0, 1, 1], [], []>} : vector<8x8xf32>, vector<8x8xf32>, vector<8x8xf32> -> vector<8x8xf32>
    %291 = arith.addf %287, %290 : vector<8x8xf32>
    %292 = math.tanh %291 : vector<8x8xf32>
    %293 = vector.extract_strided_slice %18 {offsets = [48, 0], sizes = [8, 8], strides = [1, 1]} : vector<64x8xf32> to vector<8x8xf32>
    %c3_140 = arith.constant 3 : index
    %c0_141 = arith.constant 0 : index
    %c0_142 = arith.constant 0 : index
    %294 = vector.load %arg4[%c3_140, %c0_141, %c0_142] : memref<4x8x8xf32, #tpu.memory_space<vmem>>, vector<1x8x8xf32>
    %295 = vector.shape_cast %294 : vector<1x8x8xf32> to vector<8x8xf32>
    %cst_143 = arith.constant dense<0.000000e+00> : vector<8x8xf32>
    %296 = tpu.matmul %266, %295, %cst_143 {dimension_numbers = #tpu.dot_dimension_numbers<[1], [0], [0], [1], [0, 0, 1, 1], [], []>} : vector<8x8xf32>, vector<8x8xf32>, vector<8x8xf32> -> vector<8x8xf32>
    %297 = arith.addf %293, %296 : vector<8x8xf32>
    %298 = arith.negf %297 : vector<8x8xf32>
    %299 = math.exp %298 : vector<8x8xf32>
    %cst_144 = arith.constant 1.000000e+00 : f32
    %300 = vector.broadcast %cst_144 : f32 to vector<8x8xf32>
    %301 = arith.addf %300, %299 : vector<8x8xf32>
    %302 = arith.divf %300, %301 : vector<8x8xf32>
    %303 = arith.mulf %286, %264 : vector<8x8xf32>
    %304 = arith.mulf %276, %292 : vector<8x8xf32>
    %305 = arith.addf %303, %304 : vector<8x8xf32>
    %306 = math.tanh %305 : vector<8x8xf32>
    %307 = arith.mulf %302, %306 : vector<8x8xf32>
    %308 = vector.extract_strided_slice %15 {offsets = [56, 0], sizes = [8, 8], strides = [1, 1]} : vector<64x8xf32> to vector<8x8xf32>
    %c0_145 = arith.constant 0 : index
    %c0_146 = arith.constant 0 : index
    %c0_147 = arith.constant 0 : index
    %309 = vector.load %arg4[%c0_145, %c0_146, %c0_147] : memref<4x8x8xf32, #tpu.memory_space<vmem>>, vector<1x8x8xf32>
    %310 = vector.shape_cast %309 : vector<1x8x8xf32> to vector<8x8xf32>
    %cst_148 = arith.constant dense<0.000000e+00> : vector<8x8xf32>
    %311 = tpu.matmul %307, %310, %cst_148 {dimension_numbers = #tpu.dot_dimension_numbers<[1], [0], [0], [1], [0, 0, 1, 1], [], []>} : vector<8x8xf32>, vector<8x8xf32>, vector<8x8xf32> -> vector<8x8xf32>
    %312 = arith.addf %308, %311 : vector<8x8xf32>
    %313 = arith.negf %312 : vector<8x8xf32>
    %314 = math.exp %313 : vector<8x8xf32>
    %cst_149 = arith.constant 1.000000e+00 : f32
    %315 = vector.broadcast %cst_149 : f32 to vector<8x8xf32>
    %316 = arith.addf %315, %314 : vector<8x8xf32>
    %317 = arith.divf %315, %316 : vector<8x8xf32>
    %318 = vector.extract_strided_slice %16 {offsets = [56, 0], sizes = [8, 8], strides = [1, 1]} : vector<64x8xf32> to vector<8x8xf32>
    %c1_150 = arith.constant 1 : index
    %c0_151 = arith.constant 0 : index
    %c0_152 = arith.constant 0 : index
    %319 = vector.load %arg4[%c1_150, %c0_151, %c0_152] : memref<4x8x8xf32, #tpu.memory_space<vmem>>, vector<1x8x8xf32>
    %320 = vector.shape_cast %319 : vector<1x8x8xf32> to vector<8x8xf32>
    %cst_153 = arith.constant dense<0.000000e+00> : vector<8x8xf32>
    %321 = tpu.matmul %307, %320, %cst_153 {dimension_numbers = #tpu.dot_dimension_numbers<[1], [0], [0], [1], [0, 0, 1, 1], [], []>} : vector<8x8xf32>, vector<8x8xf32>, vector<8x8xf32> -> vector<8x8xf32>
    %322 = arith.addf %318, %321 : vector<8x8xf32>
    %323 = arith.negf %322 : vector<8x8xf32>
    %324 = math.exp %323 : vector<8x8xf32>
    %cst_154 = arith.constant 1.000000e+00 : f32
    %325 = vector.broadcast %cst_154 : f32 to vector<8x8xf32>
    %326 = arith.addf %325, %324 : vector<8x8xf32>
    %327 = arith.divf %325, %326 : vector<8x8xf32>
    %328 = vector.extract_strided_slice %17 {offsets = [56, 0], sizes = [8, 8], strides = [1, 1]} : vector<64x8xf32> to vector<8x8xf32>
    %c2_155 = arith.constant 2 : index
    %c0_156 = arith.constant 0 : index
    %c0_157 = arith.constant 0 : index
    %329 = vector.load %arg4[%c2_155, %c0_156, %c0_157] : memref<4x8x8xf32, #tpu.memory_space<vmem>>, vector<1x8x8xf32>
    %330 = vector.shape_cast %329 : vector<1x8x8xf32> to vector<8x8xf32>
    %cst_158 = arith.constant dense<0.000000e+00> : vector<8x8xf32>
    %331 = tpu.matmul %307, %330, %cst_158 {dimension_numbers = #tpu.dot_dimension_numbers<[1], [0], [0], [1], [0, 0, 1, 1], [], []>} : vector<8x8xf32>, vector<8x8xf32>, vector<8x8xf32> -> vector<8x8xf32>
    %332 = arith.addf %328, %331 : vector<8x8xf32>
    %333 = math.tanh %332 : vector<8x8xf32>
    %334 = vector.extract_strided_slice %18 {offsets = [56, 0], sizes = [8, 8], strides = [1, 1]} : vector<64x8xf32> to vector<8x8xf32>
    %c3_159 = arith.constant 3 : index
    %c0_160 = arith.constant 0 : index
    %c0_161 = arith.constant 0 : index
    %335 = vector.load %arg4[%c3_159, %c0_160, %c0_161] : memref<4x8x8xf32, #tpu.memory_space<vmem>>, vector<1x8x8xf32>
    %336 = vector.shape_cast %335 : vector<1x8x8xf32> to vector<8x8xf32>
    %cst_162 = arith.constant dense<0.000000e+00> : vector<8x8xf32>
    %337 = tpu.matmul %307, %336, %cst_162 {dimension_numbers = #tpu.dot_dimension_numbers<[1], [0], [0], [1], [0, 0, 1, 1], [], []>} : vector<8x8xf32>, vector<8x8xf32>, vector<8x8xf32> -> vector<8x8xf32>
    %338 = arith.addf %334, %337 : vector<8x8xf32>
    %339 = arith.negf %338 : vector<8x8xf32>
    %340 = math.exp %339 : vector<8x8xf32>
    %cst_163 = arith.constant 1.000000e+00 : f32
    %341 = vector.broadcast %cst_163 : f32 to vector<8x8xf32>
    %342 = arith.addf %341, %340 : vector<8x8xf32>
    %343 = arith.divf %341, %342 : vector<8x8xf32>
    %344 = arith.mulf %327, %305 : vector<8x8xf32>
    %345 = arith.mulf %317, %333 : vector<8x8xf32>
    %346 = arith.addf %344, %345 : vector<8x8xf32>
    %347 = math.tanh %346 : vector<8x8xf32>
    %348 = arith.mulf %343, %347 : vector<8x8xf32>
    %c0_164 = arith.constant 0 : index
    %c0_165 = arith.constant 0 : index
    %349 = vector.load %arg8[%c0_164, %c0_165] : memref<8x4xf32, #tpu.memory_space<vmem>>, vector<8x4xf32>
    %cst_166 = arith.constant dense<0.000000e+00> : vector<8x4xf32>
    %350 = tpu.matmul %348, %349, %cst_166 {dimension_numbers = #tpu.dot_dimension_numbers<[1], [0], [0], [1], [0, 0, 1, 1], [], []>} : vector<8x8xf32>, vector<8x4xf32>, vector<8x4xf32> -> vector<8x4xf32>
    %351 = arith.addf %350, %7 : vector<8x4xf32>
    %c0_167 = arith.constant 0 : index
    %c0_168 = arith.constant 0 : index
    %352 = vector.load %arg9[%c0_167, %c0_168] : memref<8x4xf32, #tpu.memory_space<vmem>>, vector<8x4xf32>
    %353 = arith.addf %351, %352 : vector<8x4xf32>
    %cst_169 = arith.constant 1.000000e+00 : f32
    %354 = vector.broadcast %cst_169 : f32 to vector<8x4xf32>
    %355 = arith.mulf %353, %354 : vector<8x4xf32>
    %cst_170 = arith.constant dense<0xFF800000> : vector<8xf32>
    %356 = vector.multi_reduction <maximumf>, %355, %cst_170 [1] : vector<8x4xf32> to vector<8xf32>
    %357 = vector.shape_cast %356 : vector<8xf32> to vector<8x1xf32>
    %358 = vector.broadcast %357 : vector<8x1xf32> to vector<8x4xf32>
    %359 = arith.subf %355, %358 : vector<8x4xf32>
    %360 = math.exp %359 : vector<8x4xf32>
    %cst_171 = arith.constant dense<0.000000e+00> : vector<8xf32>
    %361 = vector.multi_reduction <add>, %360, %cst_171 [1] : vector<8x4xf32> to vector<8xf32>
    %362 = vector.shape_cast %361 : vector<8xf32> to vector<8x1xf32>
    %363 = tpu.reciprocal %362 : vector<8x1xf32> -> vector<8x1xf32>
    %364 = vector.broadcast %363 : vector<8x1xf32> to vector<8x4xf32>
    %365 = arith.mulf %360, %364 : vector<8x4xf32>
    %366 = tpu.concatenate %6, %365 in 1 : vector<8x4xf32>, vector<8x4xf32> -> vector<8x8xf32>
    %c0_172 = arith.constant 0 : index
    %c0_173 = arith.constant 0 : index
    %367 = vector.load %arg10[%c0_172, %c0_173] : memref<8x8xf32, #tpu.memory_space<vmem>>, vector<8x8xf32>
    tpu.vector_store %arg10[%c0_172, %c0_173], %366 {strides = array<i32>} : memref<8x8xf32, #tpu.memory_space<vmem>>, vector<8x8xf32>,
    return
  }
  func.func @transform_0(%arg0: i32) -> (i32, i32, i32) {
    %c0_i32 = arith.constant 0 : i32
    %c0_i32_0 = arith.constant 0 : i32
    %c0_i32_1 = arith.constant 0 : i32
    return %c0_i32, %arg0, %c0_i32_0 : i32, i32, i32
  }
  func.func @transform_1(%arg0: i32) -> (i32, i32) {
    %c0_i32 = arith.constant 0 : i32
    %c0_i32_0 = arith.constant 0 : i32
    return %arg0, %c0_i32 : i32, i32
  }
  func.func @transform_2(%arg0: i32) -> (i32, i32) {
    %c0_i32 = arith.constant 0 : i32
    %c0_i32_0 = arith.constant 0 : i32
    %c0_i32_1 = arith.constant 0 : i32
    return %c0_i32, %c0_i32_0 : i32, i32
  }
  func.func @transform_3(%arg0: i32) -> (i32, i32, i32) {
    %c0_i32 = arith.constant 0 : i32
    %c0_i32_0 = arith.constant 0 : i32
    %c0_i32_1 = arith.constant 0 : i32
    %c0_i32_2 = arith.constant 0 : i32
    return %c0_i32, %c0_i32_0, %c0_i32_1 : i32, i32, i32
  }
  func.func @transform_4(%arg0: i32) -> (i32, i32) {
    %c0_i32 = arith.constant 0 : i32
    %c0_i32_0 = arith.constant 0 : i32
    %c0_i32_1 = arith.constant 0 : i32
    return %c0_i32, %c0_i32_0 : i32, i32
  }
  func.func @transform_5(%arg0: i32) -> (i32, i32) {
    %c0_i32 = arith.constant 0 : i32
    %c0_i32_0 = arith.constant 0 : i32
    %c0_i32_1 = arith.constant 0 : i32
    return %c0_i32, %c0_i32_0 : i32, i32
  }
  func.func @transform_6(%arg0: i32) -> (i32, i32) {
    %c0_i32 = arith.constant 0 : i32
    %c0_i32_0 = arith.constant 0 : i32
    %c0_i32_1 = arith.constant 0 : i32
    return %c0_i32, %c0_i32_0 : i32, i32
  }
  func.func @transform_7(%arg0: i32) -> (i32, i32) {
    %c0_i32 = arith.constant 0 : i32
    %c0_i32_0 = arith.constant 0 : i32
    %c0_i32_1 = arith.constant 0 : i32
    return %c0_i32, %c0_i32_0 : i32, i32
  }
  func.func @transform_8(%arg0: i32) -> (i32, i32) {
    %c0_i32 = arith.constant 0 : i32
    %c0_i32_0 = arith.constant 0 : i32
    return %arg0, %c0_i32 : i32, i32
  }
  func.func @transform_9(%arg0: i32) -> (i32, i32) {
    %c0_i32 = arith.constant 0 : i32
    %c0_i32_0 = arith.constant 0 : i32
    return %arg0, %c0_i32 : i32, i32
  }
}

</mosaic_0001>

<bundles_post_ra>
// kernel: tpu_custom_call.1
= control target key start
LH: loop header
LB: loop body
LE: loop exit
PB: predicated region body
PF: predicated region fallthrough
CT: control target
= control target key end

     0   :  { %s4155_s30 = smov 0   ;;  %s4157_s10 = smov 0   ;;  %s4579_s0 = inlined_call_operand.vmem [shape: f32[8,16,4], index: 0, kind: input, shape index: {}]   ;;  %s4580_s1 = inlined_call_operand.vmem [shape: f32[16,32], index: 1, kind: input, shape index: {}]   ;;  %s4581_s2 = inlined_call_operand.vmem [shape: f32[4,32], index: 2, kind: input, shape index: {}]   ;;  %s4582_s3 = inlined_call_operand.vmem [shape: f32[4,8,8], index: 3, kind: input, shape index: {}]   ;;  %s4583_s4 = inlined_call_operand.vmem [shape: f32[1,32], index: 4, kind: input, shape index: {}]   ;;  %s4584_s5 = inlined_call_operand.vmem [shape: f32[32,8], index: 5, kind: input, shape index: {}]   ;;  %s4585_s6 = inlined_call_operand.vmem [shape: f32[1,8], index: 6, kind: input, shape index: {}]   ;;  %s4586_s7 = inlined_call_operand.vmem [shape: f32[8,4], index: 7, kind: input, shape index: {}]   ;;  %s4587_s8 = inlined_call_operand.vmem [shape: f32[16,4], index: 8, kind: input, shape index: {}]   ;;  %s4588_s9 = inlined_call_operand.vmem [shape: f32[16,8], index: 9, kind: output, shape index: {}]  }
   0x1   :  { %s4159_s11 = smov 0  }
   0x2 LB: > { %s3547_s12 = sadd.s32 4294967295, %s4093_s11   ;;  %s4172_s13 = sadd.s32 1, %s4093_s11   ;;  %s4093_s11 = sphi %s4159_s11, %s4591_s11   ;;  %s4089_s10 = sphi %s4157_s10, %s4590_s10   ;;  %s4085_s30 = sphi %s4155_s30, %s4589_s30  }
   0x3   : > { %s23_s14 = ssub.s32 %s4093_s11, %s4172_s13  ;;  %s26_s15 = sadd.s32 1, %s4089_s10 }
   0x4   : > { %p24_p0 = scmp.eq.s32.totalorder %s23_s14, 0  ;;  %p33_p1 = scmp.ne.s32.totalorder %s4089_s10, %s4085_s30 }
   0x5   : > { %p34_p2 = scmp.eq.s32.totalorder %s4093_s11, 0  ;;  %p3550_p4 = scmp.ge.s32.totalorder %s4093_s11, 2 }
   0x6   : > { %s4181_s16 = scalar_select %p24_p0, %s4089_s10, %s26_s15  }
   0x7   : > { %p35_p3 = por %p34_p2, %p33_p1  ;;  %281 = sbr.rel (%p3550_p4) target bundleno = 22 (0x16), region = 40 }
   0xe   : > { %284 = sbr.rel (!%p35_p3) target bundleno = 22 (0x16), region = 44  ;;  %s286_s17 = sand.u32 (%p35_p3), 1, %s4089_s10  }
   0xf   : > { %s3552_s18 = sshll.u32 (%p35_p3), %s4093_s11, 3  ;;  %s3551_s19 = sshll.u32 (%p35_p3), %s286_s17, 6 }
  0x10   : > { %s290_s22 = scalar_lea.vmem (%p35_p3), %s4579_s0, %s3552_s18  ;;  %s288_s23 = scalar_lea.vmem (%p35_p3), [#allocation2], %s3551_s19 }
  0x11   : > { %v332_v0 = vld [vmem:[%s290_s22] sm:$0xff] (%p35_p3)  ;;  %v334_v1 = vld [vmem:[%s290_s22 + $0x10] sm:$0xff] (%p35_p3) }
  0x12   : > { %v336_v2 = vld [vmem:[%s290_s22 + $0x20] sm:$0xff] (%p35_p3)  ;;  %333 = vst [vmem:[%s288_s23] sm:$0xff] (%p35_p3), %v332_v0  ;;  %335 = vst [vmem:[%s288_s23 + $0x8] sm:$0xff] (%p35_p3), %v334_v1  ;;  %v338_v3 = vld [vmem:[%s290_s22 + $0x30] sm:$0xff] (%p35_p3) }
  0x13   : > { %337 = vst [vmem:[%s288_s23 + $0x10] sm:$0xff] (%p35_p3), %v336_v2  ;;  %v340_v4 = vld [vmem:[%s290_s22 + $0x40] sm:$0xff] (%p35_p3)  ;;  %v342_v5 = vld [vmem:[%s290_s22 + $0x50] sm:$0xff] (%p35_p3)  ;;  %339 = vst [vmem:[%s288_s23 + $0x18] sm:$0xff] (%p35_p3), %v338_v3 }
  0x14   : > { %341 = vst [vmem:[%s288_s23 + $0x20] sm:$0xff] (%p35_p3), %v340_v4  ;;  %343 = vst [vmem:[%s288_s23 + $0x28] sm:$0xff] (%p35_p3), %v342_v5  ;;  %v344_v6 = vld [vmem:[%s290_s22 + $0x60] sm:$0xff] (%p35_p3)  ;;  %v346_v7 = vld [vmem:[%s290_s22 + $0x70] sm:$0xff] (%p35_p3) }
  0x15   : > { %345 = vst [vmem:[%s288_s23 + $0x30] sm:$0xff] %v344_v6  ;;  %347 = vst [vmem:[%s288_s23 + $0x38] sm:$0xff] %v346_v7 }
  0x16 PF: > { %p3553_p5 = scmp.ge.s32.totalorder %s4093_s11, 1  ;;  %p366_p6 = scmp.lt.s32.totalorder %s4093_s11, 3 }
  0x18   : > { %p367_p7 = pnand %p3553_p5, %p366_p6 }
  0x19   : > { %v521_v8 = vld [vmem:[%s4581_s2] sm:$0xf] (!%p367_p7)  ;;  %vm554_vm0 = vcmask (!%p367_p7), 1043456   ;;  %v429_v10 = vld [vmem:[%s4584_s5 + $0x8] sm:$0xff] (!%p367_p7)  ;;  %v4095_v11 = vmov (!%p367_p7), 0.0|0.0   ;;  %s373_s14 = sand.u32 (!%p367_p7), 1, %s4085_s30  }
  0x1a   : > { %370 = sbr.rel (%p367_p7) target bundleno = 7258 (0x1c5a), region = 90  ;;  %v428_v9 = vld [vmem:[%s4584_s5] sm:$0xff] (!%p367_p7)  ;;  %3898 = vmatprep.subr.bf16.mxu0 (!%p367_p7), %v4095_v11  ;;  %3719 = vmatprep.subr.msk.mxu1 (!%p367_p7), %vm554_vm0, %v521_v8  ;;  %v430_v13 = vld [vmem:[%s4584_s5 + $0x10] sm:$0xff] (!%p367_p7)  ;;  %v431_v14 = vld [vmem:[%s4584_s5 + $0x18] sm:$0xff] (!%p367_p7)  ;;  %s3554_s20 = sshll.u32 (!%p367_p7), %s373_s14, 6  ;;  %vm529_vm1 = vcmask (!%p367_p7), 31744  }
  0x1b   : > { %v3899_v12 = vpack.c.bf16 (!%p367_p7), %v429_v10, %v428_v9  ;;  %3720 = vmatpush3.msk.msra.mxu1 (!%p367_p7), %vm554_vm0, %v521_v8  ;;  %p415_p8 = scmp.lt.s32.totalorder (!%p367_p7), %s3547_s12, 1  ;;  %v4096_v15 = vmov (!%p367_p7), 0.0   ;;  %v3902_v16 = vpack.c.bf16 (!%p367_p7), %v431_v14, %v430_v13  ;;  %s4210_s30 = scalar_lea.vmem (!%p367_p7), [#allocation2], %s3554_s20  ;;  %v4217_v19 = vld [vmem:[%s4582_s3 + $0x10] sm:$0xff] (!%p367_p7)  ;;  %vm4097_vm2 = vmmov (!%p367_p7), 0   ;;  %v4240_v24 = vld [vmem:[%s4582_s3] sm:$0xff] (!%p367_p7) }
  0x1c   : > { %3743 = vmatprep.subr.mxu1 (!%p367_p7), %v4096_v15  ;;  %v513_v17 = vld [vmem:[%s4210_s30] sm:$0xff] (!%p367_p7)  ;;  %v514_v18 = vld [vmem:[%s4210_s30 + $0x8] sm:$0xff] (!%p367_p7)  ;;  %3716 = vmatprep.mubr.msk.f32.mxu0 (!%p367_p7), %vm4097_vm2, %v4096_v15  ;;  %v515_v20 = vld [vmem:[%s4210_s30 + $0x10] sm:$0xff] (!%p367_p7)  ;;  %vm439_vm3 = vcmask (!%p367_p7), 261120   ;;  %s4098_s18 = smov (!%p367_p7), 8   ;;  %s4099_s19 = smov (!%p367_p7), 16  }
  0x1d   : > { %3900 = vmatpush3.bf16.msra.mxu0 (!%p367_p7), %v3899_v12  ;;  %3721 = vmatprep.mubr.msk.f32.mxu1 (!%p367_p7), %vm529_vm1, %v513_v17  ;;  %v516_v21 = vld [vmem:[%s4210_s30 + $0x18] sm:$0xff] (!%p367_p7)  ;;  %v517_v23 = vld [vmem:[%s4210_s30 + $0x20] sm:$0xff] (!%p367_p7)  ;;  %v518_v25 = vld [vmem:[%s4210_s30 + $0x28] sm:$0xff] (!%p367_p7)  ;;  %s4100_s20 = smov (!%p367_p7), 112   ;;  %s4102_s21 = smov (!%p367_p7), 104   ;;  %vm664_vm4 = vcmask (!%p367_p7), 64512  }
  0x1e   : > { %3901 = vmatprep.subr.bf16.mxu0 (!%p367_p7), %v4095_v11  ;;  %3722 = vmatmul.mubr.msk.f32.vlgmr.msra.gmra.mrb[0].mxu1 (!%p367_p7), %vm529_vm1, %v514_v18  ;;  %v519_v26 = vld [vmem:[%s4210_s30 + $0x30] sm:$0xff] (!%p367_p7)  ;;  %v4254_v27 = vld [vmem:[%s4582_s3 + $0x8] sm:$0xff] (!%p367_p7)  ;;  %v520_v28 = vld [vmem:[%s4210_s30 + $0x38] sm:$0xff] (!%p367_p7)  ;;  %s4101_s30 = smov (!%p367_p7), 24   ;;  %s4103_s27 = smov (!%p367_p7), 124  }
  0x1f   : > { %3744 = vmatpush3.msra.mxu1 (!%p367_p7), %v4217_v19  ;;  %3724 = vmatprep.mubr.msk.f32.mxu1 (!%p367_p7), %vm529_vm1, %v515_v20  ;;  %v4267_v29 = vld [vmem:[%s4582_s3 + $0x18] sm:$0xff] (!%p367_p7)  ;;  %v3560_v30 = vld [vmem:[%s4583_s4] ss:$0 sm:$0xff] (!%p367_p7)  ;;  %s4104_s15 = smov (!%p367_p7), 4  }
  0x20   : > { %3753 = vmatprep.subr.mxu1 (!%p367_p7), %v4096_v15 }
  0x21   : > { %s4593_s12 = smov (!%p415_p8, %s3547_s12), 1  ;;  %3903 = vmatpush3.bf16.msra.mxu0 %v3902_v16 }
  0x22   : > { %s4226_s23 = sshll.u32 %s4593_s12, 3  ;;  %3733 = vmatprep.subr.mxu0 %v4096_v15  ;;  %3725 = vmatmul.mubr.msk.f32.gmra.mrb[2].mxu1 %vm529_vm1, %v516_v21 }
  0x23   : > { %s418_s26 = scalar_lea.vmem %s4580_s1, %s4226_s23  ;;  %3727 = vmatprep.mubr.msk.f32.mxu1 %vm529_vm1, %v517_v23  ;;  %s422_s14 = scalar_lea.vmem %s4587_s8, %s4226_s23 }
  0x24   : > { %v427_v22 = vld [vmem:[%s418_s26] sm:$0xff] }
  0x25   : > { %3717 = vmatmul.mubr.msk.f32.vlgmr.msra.gmra.mrb[0].mxu0 %vm439_vm3, %v427_v22 }
  0x26   : > { %3734 = vmatpush3.msra.mxu0 %v4240_v24  ;;  %3735 = vmatprep.mubr.msk.f32.mxu0 %vm4097_vm2, %v4096_v15 }
  0x27   : > { %3738 = vmatprep.subr.mxu0 %v4096_v15  ;;  %3728 = vmatmul.mubr.msk.f32.gmra.mrb[4].mxu1 %vm529_vm1, %v518_v25 }
  0x28   : > { %3730 = vmatprep.mubr.msk.f32.mxu1 %vm529_vm1, %v519_v26 }
  0x29   : > { %3736 = vmatmul.mubr.f32.vlgmr.msra.gmra.mrb[2].mxu0 %v4096_v15 }
  0x2a   : > { %3739 = vmatpush3.msra.mxu0 %v4254_v27  ;;  %3740 = vmatprep.mubr.msk.f32.mxu0 %vm4097_vm2, %v4096_v15 }
  0x2b   : > { %3748 = vmatprep.subr.mxu0 %v4096_v15  ;;  %3731 = vmatmul.mubr.msk.f32.gmra.mrb[6].mxu1 %vm529_vm1, %v520_v28 }
  0x2c   : > { %3745 = vmatprep.mubr.msk.f32.mxu1 %vm4097_vm2, %v4096_v15 }
  0x2d   : > { %3741 = vmatmul.mubr.f32.vlgmr.msra.gmra.mrb[4].mxu0 %v4096_v15 }
  0x2e   : > { %3749 = vmatpush3.msra.mxu0 %v4267_v29  ;;  %3750 = vmatprep.mubr.msk.f32.mxu0 %vm4097_vm2, %v4096_v15 }
  0x2f   : > { %3758 = vmatprep.subr.mxu0 %v4096_v15  ;;  %3746 = vmatmul.mubr.f32.vlgmr.msra.gmra.mrb[8].mxu1 %v4096_v15 }
  0x30   : > { %3754 = vmatpush3.msra.mxu1 %v4240_v24  ;;  %3755 = vmatprep.mubr.msk.f32.mxu1 %vm4097_vm2, %v4096_v15 }
  0x31   : > { %3751 = vmatmul.mubr.f32.vlgmr.msra.gmra.mrb[6].mxu0 %v4096_v15  ;;  %3763 = vmatprep.subr.mxu1 %v4096_v15 }
  0x32   : > { %3759 = vmatpush3.msra.mxu0 %v4254_v27  ;;  %3760 = vmatprep.mubr.msk.f32.mxu0 %vm4097_vm2, %v4096_v15 }
  0x33   : > { %3768 = vmatprep.subr.mxu0 %v4096_v15 }
  0xf1   : > { %v3723_v31 = vpop.f32.mrb[0].mxu1 }
  0xf2   : > { %v4290_v32 = vadd.f32 %v3723_v31, %v3560_v30  ;;  %v624_v33 = vpop.f32.mrb[1].mxu1 }
  0xf3   : > { %v625_v56 = vadd.f32 %v3560_v30, %v624_v33 }
  0xf5   : > { %v3726_v34 = vpop.f32.mrb[2].mxu1 }
  0xf6   : > { %v4294_v36 = vadd.f32 %v3726_v34, %v3560_v30  ;;  %v634_v37 = vpop.f32.mrb[3].mxu1 }
  0xf7   : > { %v4296_v39 = vadd.f32 %v3560_v30, %v634_v37 }
  0xf8   : > { %v4292_v35 = vpop.f32.mrb[0].mxu0 }
  0xf9   : > { %v3718_v38 = vpop.f32.mrb[1].mxu0 }
  0xfa   : > { %v3729_v40 = vpop.f32.mrb[4].mxu1 }
  0xfb   : > { %v4298_v42 = vadd.f32 %v3729_v40, %v3560_v30  ;;  %v644_v43 = vpop.f32.mrb[5].mxu1 }
  0xfc   : > { %v734_v41 = vpop.f32.mrb[2].mxu0  ;;  %v4300_v45 = vadd.f32 %v3560_v30, %v644_v43 }
  0xfd   : > { %v3737_v44 = vpop.f32.mrb[3].mxu0  ;;  %v738_v60 = vadd.f32 %v734_v41, %v625_v56 }
  0xfe   : > { %v3732_v46 = vpop.f32.mrb[6].mxu1 }
  0xff   : > { %v4302_v48 = vadd.f32 %v3732_v46, %v3560_v30  ;;  %v654_v49 = vpop.f32.mrb[7].mxu1  ;;  %v3570_v61 = vmul.f32 -1.442695, %v738_v60 }
 0x100   : > { %v813_v47 = vpop.f32.mrb[4].mxu0  ;;  %v4305_v51 = vadd.f32 %v3560_v30, %v654_v49 }
 0x101   : > { %818 = vrot.lane.b32.xlu1 %v813_v47, %s4098_s18  ;;  %v3742_v50 = vpop.f32.mrb[5].mxu0 }
 0x102   : > { %v896_v52 = vpop.f32.mrb[8].mxu1 }
 0x103   : > { %901 = vrot.lane.b32.xlu0 %v896_v52, %s4099_s19  ;;  %v3747_v53 = vpop.f32.mrb[9].mxu1 }
 0x104   : > { %v974_v54 = vpop.f32.mrb[6].mxu0 }
 0x105   : > { %v3752_v55 = vpop.f32.mrb[7].mxu0 }
 0x173   : > { %v819_v3 = vpop.permute.xlu1 %818 }
 0x174   : > { %v821_v4 = vadd.f32 %v819_v3, %v625_v56 }
 0x175   : > { %v902_v57 = vpop.permute.xlu0 %901 }
 0x176   : > { %v904_v58 = vadd.f32 %v902_v57, %v625_v56  ;;  %v3572_v5 = vmul.f32 -1.442695, %v821_v4 }
 0x178   : > { %3938 = vtanh.f32 %v904_v58 }
 0x179   : > { %3940 = vpow2.f32 %v3570_v61 }
 0x182   : > { %v3939_v59 = vpop.eup %3938 }
 0x183   : > { %991 = vrot.lane.b32.xlu0 %v3939_v59, %s4100_s20  ;;  %v3941_v62 = vpop.eup %3940 }
 0x184   : > { %v742_v63 = vadd.f32 1.0, %v3941_v62 }
 0x186   : > { %3942 = vrcp.f32 %v742_v63 }
 0x187   : > { %979 = vrot.lane.b32.xlu0 %v974_v54, %s4101_s30  ;;  %3944 = vpow2.f32 %v3572_v5 }
 0x190   : > { %v3943_v0 = vpop.eup %3942 }
 0x191   : > { %v3945_v6 = vpop.eup %3944 }
 0x192   : > { %v825_v7 = vadd.f32 1.0, %v3945_v6 }
 0x194   : > { %3946 = vrcp.f32 %v825_v7 }
 0x19e   : > { %v3947_v8 = vpop.eup %3946 }
 0x19f   : > { %v989_v9 = vmul.f32 0.0, %v3947_v8 }
 0x1f5   : > { %v992_v1 = vpop.permute.xlu0 %991 }
 0x1f6   : > { %v994_v2 = vmul.f32 %v3943_v0, %v992_v1 }
 0x1f8   : > { %996 = vrot.lane.b32.xlu1 %v994_v2, %s4098_s18 }
 0x1f9   : > { %v980_v13 = vpop.permute.xlu0 %979 }
 0x1fa   : > { %v982_v14 = vadd.f32 %v980_v13, %v625_v56 }
 0x1fc   : > { %v3575_v16 = vmul.f32 -1.442695, %v982_v14 }
 0x26a   : > { %v997_v10 = vpop.permute.xlu1 %996 }
 0x26b   : > { %v4311_v11 = vadd.f32 %v997_v10, %v989_v9 }
 0x26d   : > { %3948 = vtanh.f32 %v4311_v11 }
 0x26e   : > { %3950 = vpow2.f32 %v3575_v16 }
 0x277   : > { %v3949_v12 = vpop.eup %3948 }
 0x278   : > { %1002 = vrot.lane.b32.xlu1 %v3949_v12, %s4099_s19  ;;  %v3951_v17 = vpop.eup %3950 }
 0x279   : > { %v986_v18 = vadd.f32 1.0, %v3951_v17 }
 0x27b   : > { %3952 = vrcp.f32 %v986_v18 }
 0x285   : > { %v3953_v20 = vpop.eup %3952 }
 0x2ea   : > { %v1003_v21 = vpop.permute.xlu1 %1002 }
 0x2eb   : > { %v1005_v22 = vmul.f32 %v3953_v20, %v1003_v21 }
 0x2ed   : > { %1007 = vrot.lane.b32.xlu0 %v1005_v22, %s4102_s21 }
 0x35f   : > { %v1008_v23 = vpop.permute.xlu0 %1007 }
 0x360   : > { %3756 = vmatmul.mubr.msk.f32.vlgmr.msra.gmra.mrb[10].mxu1 %vm664_vm4, %v1008_v23  ;;  %3761 = vmatmul.mubr.msk.f32.vlgmr.msra.gmra.mrb[8].mxu0 %vm664_vm4, %v1008_v23 }
 0x361   : > { %3764 = vmatpush3.msra.mxu1 %v4217_v19  ;;  %3765 = vmatprep.mubr.msk.f32.mxu1 %vm4097_vm2, %v4096_v15 }
 0x362   : > { %3769 = vmatpush3.msra.mxu0 %v4267_v29  ;;  %3770 = vmatprep.mubr.msk.f32.mxu0 %vm4097_vm2, %v4096_v15 }
 0x363   : > { %3773 = vmatprep.subr.mxu1 %v4096_v15  ;;  %3778 = vmatprep.subr.mxu0 %v4096_v15 }
 0x364   : > { %3766 = vmatmul.mubr.msk.f32.vlgmr.msra.gmra.mrb[12].mxu1 %vm664_vm4, %v1008_v23  ;;  %3771 = vmatmul.mubr.msk.f32.vlgmr.msra.gmra.mrb[10].mxu0 %vm664_vm4, %v1008_v23 }
 0x365   : > { %3774 = vmatpush3.msra.mxu1 %v4240_v24  ;;  %3775 = vmatprep.mubr.msk.f32.mxu1 %vm4097_vm2, %v4096_v15 }
 0x366   : > { %3779 = vmatpush3.msra.mxu0 %v4254_v27  ;;  %3780 = vmatprep.mubr.msk.f32.mxu0 %vm4097_vm2, %v4096_v15 }
 0x367   : > { %3783 = vmatprep.subr.mxu1 %v4096_v15  ;;  %3788 = vmatprep.subr.mxu0 %v4096_v15 }
 0x433   : > { %v1077_v25 = vpop.f32.mrb[10].mxu1  ;;  %v1154_v26 = vpop.f32.mrb[8].mxu0 }
 0x434   : > { %v3757_v28 = vpop.f32.mrb[11].mxu1  ;;  %v3762_v30 = vpop.f32.mrb[9].mxu0  ;;  %v1081_v43 = vadd.f32 %v1077_v25, %v4290_v32 }
 0x436   : > { %v3577_v44 = vmul.f32 -1.442695, %v1081_v43 }
 0x437   : > { %v1235_v31 = vpop.f32.mrb[12].mxu1  ;;  %v1311_v33 = vpop.f32.mrb[10].mxu0 }
 0x438   : > { %v3772_v34 = vpop.f32.mrb[11].mxu0  ;;  %1240 = vrot.lane.b32.xlu1 %v1235_v31, %s4099_s19  ;;  %v3767_v37 = vpop.f32.mrb[13].mxu1 }
 0x43c   : > { %1159 = vrot.lane.b32.xlu1 %v1154_v26, %s4098_s18 }
 0x440   : > { %1316 = vrot.lane.b32.xlu1 %v1311_v33, %s4101_s30 }
 0x4aa   : > { %v1241_v38 = vpop.permute.xlu1 %1240 }
 0x4ab   : > { %v1243_v40 = vadd.f32 %v1241_v38, %v4290_v32 }
 0x4ad   : > { %3954 = vtanh.f32 %v1243_v40 }
 0x4ae   : > { %3956 = vpow2.f32 %v3577_v44  ;;  %v1160_v53 = vpop.permute.xlu1 %1159 }
 0x4af   : > { %v1162_v54 = vadd.f32 %v1160_v53, %v4290_v32 }
 0x4b1   : > { %v3579_v55 = vmul.f32 -1.442695, %v1162_v54 }
 0x4b2   : > { %v1317_v63 = vpop.permute.xlu1 %1316 }
 0x4b3   : > { %v1319_v0 = vadd.f32 %v1317_v63, %v4290_v32 }
 0x4b5   : > { %v3582_v1 = vmul.f32 -1.442695, %v1319_v0 }
 0x4b7   : > { %v3955_v41 = vpop.eup %3954 }
 0x4b8   : > { %1328 = vrot.lane.b32.xlu0 %v3955_v41, %s4100_s20  ;;  %v3957_v46 = vpop.eup %3956 }
 0x4b9   : > { %v1085_v47 = vadd.f32 1.0, %v3957_v46 }
 0x4bb   : > { %3958 = vrcp.f32 %v1085_v47 }
 0x4bc   : > { %3960 = vpow2.f32 %v3579_v55 }
 0x4c5   : > { %v3959_v49 = vpop.eup %3958 }
 0x4c6   : > { %v3961_v56 = vpop.eup %3960 }
 0x4c7   : > { %v1166_v57 = vadd.f32 1.0, %v3961_v56 }
 0x4c9   : > { %3962 = vrcp.f32 %v1166_v57 }
 0x4d3   : > { %v3963_v58 = vpop.eup %3962 }
 0x4d4   : > { %v1326_v59 = vmul.f32 %v3963_v58, %v4311_v11 }
 0x52a   : > { %v1329_v50 = vpop.permute.xlu0 %1328 }
 0x52b   : > { %v1331_v52 = vmul.f32 %v3959_v49, %v1329_v50 }
 0x52d   : > { %1333 = vrot.lane.b32.xlu0 %v1331_v52, %s4098_s18 }
 0x59f   : > { %v1334_v60 = vpop.permute.xlu0 %1333 }
 0x5a0   : > { %v4345_v61 = vadd.f32 %v1334_v60, %v1326_v59 }
 0x5a2   : > { %3964 = vtanh.f32 %v4345_v61 }
 0x5a3   : > { %3966 = vpow2.f32 %v3582_v1 }
 0x5ac   : > { %v3965_v62 = vpop.eup %3964 }
 0x5ad   : > { %1339 = vrot.lane.b32.xlu0 %v3965_v62, %s4099_s19  ;;  %v3967_v2 = vpop.eup %3966 }
 0x5ae   : > { %v1323_v3 = vadd.f32 1.0, %v3967_v2 }
 0x5b0   : > { %3968 = vrcp.f32 %v1323_v3 }
 0x5ba   : > { %v3969_v4 = vpop.eup %3968 }
 0x61f   : > { %v1340_v5 = vpop.permute.xlu0 %1339 }
 0x620   : > { %v1342_v6 = vmul.f32 %v3969_v4, %v1340_v5 }
 0x622   : > { %1344 = vrot.lane.b32.xlu1 %v1342_v6, %s4102_s21 }
 0x694   : > { %v1345_v7 = vpop.permute.xlu1 %1344 }
 0x695   : > { %3776 = vmatmul.mubr.msk.f32.vlgmr.msra.gmra.mrb[14].mxu1 %vm664_vm4, %v1345_v7  ;;  %3781 = vmatmul.mubr.msk.f32.vlgmr.msra.gmra.mrb[12].mxu0 %vm664_vm4, %v1345_v7 }
 0x696   : > { %3784 = vmatpush3.msra.mxu1 %v4217_v19  ;;  %3785 = vmatprep.mubr.msk.f32.mxu1 %vm4097_vm2, %v4096_v15 }
 0x697   : > { %3789 = vmatpush3.msra.mxu0 %v4267_v29  ;;  %3790 = vmatprep.mubr.msk.f32.mxu0 %vm4097_vm2, %v4096_v15 }
 0x698   : > { %3793 = vmatprep.subr.mxu1 %v4096_v15  ;;  %3798 = vmatprep.subr.mxu0 %v4096_v15 }
 0x699   : > { %3786 = vmatmul.mubr.msk.f32.vlgmr.msra.gmra.mrb[16].mxu1 %vm664_vm4, %v1345_v7  ;;  %3791 = vmatmul.mubr.msk.f32.vlgmr.msra.gmra.mrb[14].mxu0 %vm664_vm4, %v1345_v7 }
 0x69a   : > { %3794 = vmatpush3.msra.mxu1 %v4240_v24  ;;  %3795 = vmatprep.mubr.msk.f32.mxu1 %vm4097_vm2, %v4096_v15 }
 0x69b   : > { %3799 = vmatpush3.msra.mxu0 %v4254_v27  ;;  %3800 = vmatprep.mubr.msk.f32.mxu0 %vm4097_vm2, %v4096_v15 }
 0x69c   : > { %3803 = vmatprep.subr.mxu1 %v4096_v15  ;;  %3808 = vmatprep.subr.mxu0 %v4096_v15 }
 0x768   : > { %v1414_v32 = vpop.f32.mrb[14].mxu1  ;;  %v1491_v8 = vpop.f32.mrb[12].mxu0 }
 0x769   : > { %v3777_v9 = vpop.f32.mrb[15].mxu1  ;;  %v3782_v10 = vpop.f32.mrb[13].mxu0  ;;  %v1418_v20 = vadd.f32 %v1414_v32, %v4296_v39 }
 0x76b   : > { %v3584_v21 = vmul.f32 -1.442695, %v1418_v20 }
 0x76c   : > { %v1572_v11 = vpop.f32.mrb[16].mxu1  ;;  %v1648_v12 = vpop.f32.mrb[14].mxu0 }
 0x76d   : > { %v3792_v13 = vpop.f32.mrb[15].mxu0  ;;  %1577 = vrot.lane.b32.xlu0 %v1572_v11, %s4099_s19  ;;  %v3787_v14 = vpop.f32.mrb[17].mxu1 }
 0x771   : > { %1496 = vrot.lane.b32.xlu0 %v1491_v8, %s4098_s18 }
 0x775   : > { %1653 = vrot.lane.b32.xlu0 %v1648_v12, %s4101_s30 }
 0x7df   : > { %v1578_v16 = vpop.permute.xlu0 %1577 }
 0x7e0   : > { %v1580_v17 = vadd.f32 %v1578_v16, %v4296_v39 }
 0x7e2   : > { %3970 = vtanh.f32 %v1580_v17 }
 0x7e3   : > { %3972 = vpow2.f32 %v3584_v21  ;;  %v1497_v30 = vpop.permute.xlu0 %1496 }
 0x7e4   : > { %v1499_v31 = vadd.f32 %v1497_v30, %v4296_v39 }
 0x7e6   : > { %v3586_v33 = vmul.f32 -1.442695, %v1499_v31 }
 0x7e7   : > { %v1654_v46 = vpop.permute.xlu0 %1653 }
 0x7e8   : > { %v1656_v47 = vadd.f32 %v1654_v46, %v4296_v39 }
 0x7ea   : > { %v3589_v49 = vmul.f32 -1.442695, %v1656_v47 }
 0x7ec   : > { %v3971_v18 = vpop.eup %3970 }
 0x7ed   : > { %1665 = vrot.lane.b32.xlu1 %v3971_v18, %s4100_s20  ;;  %v3973_v22 = vpop.eup %3972 }
 0x7ee   : > { %v1422_v23 = vadd.f32 1.0, %v3973_v22 }
 0x7f0   : > { %3974 = vrcp.f32 %v1422_v23 }
 0x7f1   : > { %3976 = vpow2.f32 %v3586_v33 }
 0x7fa   : > { %v3975_v25 = vpop.eup %3974 }
 0x7fb   : > { %v3977_v34 = vpop.eup %3976 }
 0x7fc   : > { %v1503_v37 = vadd.f32 1.0, %v3977_v34 }
 0x7fe   : > { %3978 = vrcp.f32 %v1503_v37 }
 0x808   : > { %v3979_v38 = vpop.eup %3978 }
 0x809   : > { %v1663_v40 = vmul.f32 %v3979_v38, %v4345_v61 }
 0x85f   : > { %v1666_v26 = vpop.permute.xlu1 %1665 }
 0x860   : > { %v1668_v28 = vmul.f32 %v3975_v25, %v1666_v26 }
 0x862   : > { %1670 = vrot.lane.b32.xlu1 %v1668_v28, %s4098_s18 }
 0x8d4   : > { %v1671_v41 = vpop.permute.xlu1 %1670 }
 0x8d5   : > { %v4380_v43 = vadd.f32 %v1671_v41, %v1663_v40 }
 0x8d7   : > { %3980 = vtanh.f32 %v4380_v43 }
 0x8d8   : > { %3982 = vpow2.f32 %v3589_v49 }
 0x8e1   : > { %v3981_v44 = vpop.eup %3980 }
 0x8e2   : > { %1676 = vrot.lane.b32.xlu1 %v3981_v44, %s4099_s19  ;;  %v3983_v50 = vpop.eup %3982 }
 0x8e3   : > { %v1660_v52 = vadd.f32 1.0, %v3983_v50 }
 0x8e5   : > { %3984 = vrcp.f32 %v1660_v52 }
 0x8ef   : > { %v3985_v53 = vpop.eup %3984 }
 0x954   : > { %v1677_v54 = vpop.permute.xlu1 %1676 }
 0x955   : > { %v1679_v55 = vmul.f32 %v3985_v53, %v1677_v54 }
 0x957   : > { %1681 = vrot.lane.b32.xlu0 %v1679_v55, %s4102_s21 }
 0x9c9   : > { %v1682_v56 = vpop.permute.xlu0 %1681 }
 0x9ca   : > { %3796 = vmatmul.mubr.msk.f32.vlgmr.msra.gmra.mrb[18].mxu1 %vm664_vm4, %v1682_v56  ;;  %3801 = vmatmul.mubr.msk.f32.vlgmr.msra.gmra.mrb[16].mxu0 %vm664_vm4, %v1682_v56 }
 0x9cb   : > { %3804 = vmatpush3.msra.mxu1 %v4217_v19  ;;  %3805 = vmatprep.mubr.msk.f32.mxu1 %vm4097_vm2, %v4096_v15 }
 0x9cc   : > { %3809 = vmatpush3.msra.mxu0 %v4267_v29  ;;  %3810 = vmatprep.mubr.msk.f32.mxu0 %vm4097_vm2, %v4096_v15 }
 0x9cd   : > { %3813 = vmatprep.subr.mxu1 %v4096_v15  ;;  %3818 = vmatprep.subr.mxu0 %v4096_v15 }
 0x9ce   : > { %3806 = vmatmul.mubr.msk.f32.vlgmr.msra.gmra.mrb[20].mxu1 %vm664_vm4, %v1682_v56  ;;  %3811 = vmatmul.mubr.msk.f32.vlgmr.msra.gmra.mrb[18].mxu0 %vm664_vm4, %v1682_v56 }
 0x9cf   : > { %3814 = vmatpush3.msra.mxu1 %v4240_v24  ;;  %3815 = vmatprep.mubr.msk.f32.mxu1 %vm4097_vm2, %v4096_v15 }
 0x9d0   : > { %3819 = vmatpush3.msra.mxu0 %v4254_v27  ;;  %3820 = vmatprep.mubr.msk.f32.mxu0 %vm4097_vm2, %v4096_v15 }
 0x9d1   : > { %3823 = vmatprep.subr.mxu1 %v4096_v15  ;;  %3828 = vmatprep.subr.mxu0 %v4096_v15 }
 0xa9d   : > { %v1751_v39 = vpop.f32.mrb[18].mxu1  ;;  %v1828_v57 = vpop.f32.mrb[16].mxu0 }
 0xa9e   : > { %v3797_v58 = vpop.f32.mrb[19].mxu1  ;;  %v3802_v59 = vpop.f32.mrb[17].mxu0  ;;  %v1755_v3 = vadd.f32 %v1751_v39, %v4294_v36 }
 0xaa0   : > { %v3591_v4 = vmul.f32 -1.442695, %v1755_v3 }
 0xaa1   : > { %v1909_v60 = vpop.f32.mrb[20].mxu1  ;;  %v1985_v61 = vpop.f32.mrb[18].mxu0 }
 0xaa2   : > { %v3812_v62 = vpop.f32.mrb[19].mxu0  ;;  %1914 = vrot.lane.b32.xlu1 %v1909_v60, %s4099_s19  ;;  %v3807_v63 = vpop.f32.mrb[21].mxu1 }
 0xaa6   : > { %1833 = vrot.lane.b32.xlu1 %v1828_v57, %s4098_s18 }
 0xaaa   : > { %1990 = vrot.lane.b32.xlu1 %v1985_v61, %s4101_s30 }
 0xb14   : > { %v1915_v0 = vpop.permute.xlu1 %1914 }
 0xb15   : > { %v1917_v1 = vadd.f32 %v1915_v0, %v4294_v36 }
 0xb17   : > { %3986 = vtanh.f32 %v1917_v1 }
 0xb18   : > { %3988 = vpow2.f32 %v3591_v4  ;;  %v1834_v9 = vpop.permute.xlu1 %1833 }
 0xb19   : > { %v1836_v10 = vadd.f32 %v1834_v9, %v4294_v36 }
 0xb1b   : > { %v3593_v11 = vmul.f32 -1.442695, %v1836_v10 }
 0xb1c   : > { %v1991_v21 = vpop.permute.xlu1 %1990 }
 0xb1d   : > { %v1993_v22 = vadd.f32 %v1991_v21, %v4294_v36 }
 0xb1f   : > { %v3596_v23 = vmul.f32 -1.442695, %v1993_v22 }
 0xb21   : > { %v3987_v2 = vpop.eup %3986 }
 0xb22   : > { %2002 = vrot.lane.b32.xlu0 %v3987_v2, %s4100_s20  ;;  %v3989_v5 = vpop.eup %3988 }
 0xb23   : > { %v1759_v6 = vadd.f32 1.0, %v3989_v5 }
 0xb25   : > { %3990 = vrcp.f32 %v1759_v6 }
 0xb26   : > { %3992 = vpow2.f32 %v3593_v11 }
 0xb2f   : > { %v3991_v7 = vpop.eup %3990 }
 0xb30   : > { %v3993_v12 = vpop.eup %3992 }
 0xb31   : > { %v1840_v13 = vadd.f32 1.0, %v3993_v12 }
 0xb33   : > { %3994 = vrcp.f32 %v1840_v13 }
 0xb3d   : > { %v3995_v14 = vpop.eup %3994 }
 0xb3e   : > { %v2000_v16 = vmul.f32 %v3995_v14, %v4380_v43 }
 0xb94   : > { %v2003_v32 = vpop.permute.xlu0 %2002 }
 0xb95   : > { %v2005_v8 = vmul.f32 %v3991_v7, %v2003_v32 }
 0xb97   : > { %2007 = vrot.lane.b32.xlu0 %v2005_v8, %s4098_s18 }
 0xc09   : > { %v2008_v17 = vpop.permute.xlu0 %2007 }
 0xc0a   : > { %v4415_v18 = vadd.f32 %v2008_v17, %v2000_v16 }
 0xc0c   : > { %3996 = vtanh.f32 %v4415_v18 }
 0xc0d   : > { %3998 = vpow2.f32 %v3596_v23 }
 0xc16   : > { %v3997_v20 = vpop.eup %3996 }
 0xc17   : > { %2013 = vrot.lane.b32.xlu0 %v3997_v20, %s4099_s19  ;;  %v3999_v25 = vpop.eup %3998 }
 0xc18   : > { %v1997_v26 = vadd.f32 1.0, %v3999_v25 }
 0xc1a   : > { %4000 = vrcp.f32 %v1997_v26 }
 0xc24   : > { %v4001_v28 = vpop.eup %4000 }
 0xc89   : > { %v2014_v30 = vpop.permute.xlu0 %2013 }
 0xc8a   : > { %v2016_v31 = vmul.f32 %v4001_v28, %v2014_v30 }
 0xc8c   : > { %2018 = vrot.lane.b32.xlu1 %v2016_v31, %s4102_s21 }
 0xcfe   : > { %v2019_v33 = vpop.permute.xlu1 %2018 }
 0xcff   : > { %3816 = vmatmul.mubr.msk.f32.vlgmr.msra.gmra.mrb[22].mxu1 %vm664_vm4, %v2019_v33  ;;  %3821 = vmatmul.mubr.msk.f32.vlgmr.msra.gmra.mrb[20].mxu0 %vm664_vm4, %v2019_v33 }
 0xd00   : > { %3824 = vmatpush3.msra.mxu1 %v4217_v19  ;;  %3825 = vmatprep.mubr.msk.f32.mxu1 %vm4097_vm2, %v4096_v15 }
 0xd01   : > { %3829 = vmatpush3.msra.mxu0 %v4267_v29  ;;  %3830 = vmatprep.mubr.msk.f32.mxu0 %vm4097_vm2, %v4096_v15 }
 0xd02   : > { %3833 = vmatprep.subr.mxu1 %v4096_v15  ;;  %3838 = vmatprep.subr.mxu0 %v4096_v15 }
 0xd03   : > { %3826 = vmatmul.mubr.msk.f32.vlgmr.msra.gmra.mrb[24].mxu1 %vm664_vm4, %v2019_v33  ;;  %3831 = vmatmul.mubr.msk.f32.vlgmr.msra.gmra.mrb[22].mxu0 %vm664_vm4, %v2019_v33 }
 0xd04   : > { %3834 = vmatpush3.msra.mxu1 %v4240_v24  ;;  %3835 = vmatprep.mubr.msk.f32.mxu1 %vm4097_vm2, %v4096_v15 }
 0xd05   : > { %3839 = vmatpush3.msra.mxu0 %v4254_v27  ;;  %3840 = vmatprep.mubr.msk.f32.mxu0 %vm4097_vm2, %v4096_v15 }
 0xd06   : > { %3843 = vmatprep.subr.mxu1 %v4096_v15  ;;  %3848 = vmatprep.subr.mxu0 %v4096_v15 }
 0xdd2   : > { %v2088_v36 = vpop.f32.mrb[22].mxu1  ;;  %v2165_v34 = vpop.f32.mrb[20].mxu0 }
 0xdd3   : > { %v3817_v37 = vpop.f32.mrb[23].mxu1  ;;  %v3822_v38 = vpop.f32.mrb[21].mxu0  ;;  %v2092_v50 = vadd.f32 %v2088_v36, %v4300_v45 }
 0xdd5   : > { %v3598_v52 = vmul.f32 -1.442695, %v2092_v50 }
 0xdd6   : > { %v2246_v40 = vpop.f32.mrb[24].mxu1  ;;  %v2322_v41 = vpop.f32.mrb[22].mxu0 }
 0xdd7   : > { %v3832_v43 = vpop.f32.mrb[23].mxu0  ;;  %2251 = vrot.lane.b32.xlu0 %v2246_v40, %s4099_s19  ;;  %v3827_v44 = vpop.f32.mrb[25].mxu1 }
 0xddb   : > { %2170 = vrot.lane.b32.xlu0 %v2165_v34, %s4098_s18 }
 0xddf   : > { %2327 = vrot.lane.b32.xlu0 %v2322_v41, %s4101_s30 }
 0xe49   : > { %v2252_v46 = vpop.permute.xlu0 %2251 }
 0xe4a   : > { %v2254_v47 = vadd.f32 %v2252_v46, %v4300_v45 }
 0xe4c   : > { %4002 = vtanh.f32 %v2254_v47 }
 0xe4d   : > { %4004 = vpow2.f32 %v3598_v52  ;;  %v2171_v57 = vpop.permute.xlu0 %2170 }
 0xe4e   : > { %v2173_v58 = vadd.f32 %v2171_v57, %v4300_v45 }
 0xe50   : > { %v3600_v59 = vmul.f32 -1.442695, %v2173_v58 }
 0xe51   : > { %v2328_v3 = vpop.permute.xlu0 %2327 }
 0xe52   : > { %v2330_v4 = vadd.f32 %v2328_v3, %v4300_v45 }
 0xe54   : > { %v3603_v5 = vmul.f32 -1.442695, %v2330_v4 }
 0xe56   : > { %v4003_v49 = vpop.eup %4002 }
 0xe57   : > { %2339 = vrot.lane.b32.xlu1 %v4003_v49, %s4100_s20  ;;  %v4005_v53 = vpop.eup %4004 }
 0xe58   : > { %v2096_v54 = vadd.f32 1.0, %v4005_v53 }
 0xe5a   : > { %4006 = vrcp.f32 %v2096_v54 }
 0xe5b   : > { %4008 = vpow2.f32 %v3600_v59 }
 0xe64   : > { %v4007_v55 = vpop.eup %4006 }
 0xe65   : > { %v4009_v60 = vpop.eup %4008 }
 0xe66   : > { %v2177_v61 = vadd.f32 1.0, %v4009_v60 }
 0xe68   : > { %4010 = vrcp.f32 %v2177_v61 }
 0xe72   : > { %v4011_v62 = vpop.eup %4010 }
 0xe73   : > { %v2337_v63 = vmul.f32 %v4011_v62, %v4415_v18 }
 0xec9   : > { %v2340_v56 = vpop.permute.xlu1 %2339 }
 0xeca   : > { %v2342_v39 = vmul.f32 %v4007_v55, %v2340_v56 }
 0xecc   : > { %2344 = vrot.lane.b32.xlu1 %v2342_v39, %s4098_s18 }
 0xf3e   : > { %v2345_v0 = vpop.permute.xlu1 %2344 }
 0xf3f   : > { %v4450_v1 = vadd.f32 %v2345_v0, %v2337_v63 }
 0xf41   : > { %4012 = vtanh.f32 %v4450_v1 }
 0xf42   : > { %4014 = vpow2.f32 %v3603_v5 }
 0xf4b   : > { %v4013_v2 = vpop.eup %4012 }
 0xf4c   : > { %2350 = vrot.lane.b32.xlu1 %v4013_v2, %s4099_s19  ;;  %v4015_v6 = vpop.eup %4014 }
 0xf4d   : > { %v2334_v7 = vadd.f32 1.0, %v4015_v6 }
 0xf4f   : > { %4016 = vrcp.f32 %v2334_v7 }
 0xf59   : > { %v4017_v32 = vpop.eup %4016 }
 0xfbe   : > { %v2351_v8 = vpop.permute.xlu1 %2350 }
 0xfbf   : > { %v2353_v9 = vmul.f32 %v4017_v32, %v2351_v8 }
 0xfc1   : > { %2355 = vrot.lane.b32.xlu0 %v2353_v9, %s4102_s21 }
0x1033   : > { %v2356_v10 = vpop.permute.xlu0 %2355 }
0x1034   : > { %3836 = vmatmul.mubr.msk.f32.vlgmr.msra.gmra.mrb[26].mxu1 %vm664_vm4, %v2356_v10  ;;  %3841 = vmatmul.mubr.msk.f32.vlgmr.msra.gmra.mrb[24].mxu0 %vm664_vm4, %v2356_v10 }
0x1035   : > { %3844 = vmatpush3.msra.mxu1 %v4217_v19  ;;  %3845 = vmatprep.mubr.msk.f32.mxu1 %vm4097_vm2, %v4096_v15 }
0x1036   : > { %3849 = vmatpush3.msra.mxu0 %v4267_v29  ;;  %3850 = vmatprep.mubr.msk.f32.mxu0 %vm4097_vm2, %v4096_v15 }
0x1037   : > { %3853 = vmatprep.subr.mxu1 %v4096_v15  ;;  %3858 = vmatprep.subr.mxu0 %v4096_v15 }
0x1038   : > { %3846 = vmatmul.mubr.msk.f32.vlgmr.msra.gmra.mrb[28].mxu1 %vm664_vm4, %v2356_v10  ;;  %3851 = vmatmul.mubr.msk.f32.vlgmr.msra.gmra.mrb[26].mxu0 %vm664_vm4, %v2356_v10 }
0x1039   : > { %3854 = vmatpush3.msra.mxu1 %v4240_v24  ;;  %3855 = vmatprep.mubr.msk.f32.mxu1 %vm4097_vm2, %v4096_v15 }
0x103a   : > { %3859 = vmatpush3.msra.mxu0 %v4254_v27  ;;  %3860 = vmatprep.mubr.msk.f32.mxu0 %vm4097_vm2, %v4096_v15 }
0x103b   : > { %3863 = vmatprep.subr.mxu1 %v4096_v15  ;;  %3868 = vmatprep.subr.mxu0 %v4096_v15 }
0x1107   : > { %v2425_v45 = vpop.f32.mrb[26].mxu1  ;;  %v2502_v11 = vpop.f32.mrb[24].mxu0 }
0x1108   : > { %v3837_v12 = vpop.f32.mrb[27].mxu1  ;;  %v3842_v13 = vpop.f32.mrb[25].mxu0  ;;  %v2429_v23 = vadd.f32 %v2425_v45, %v4298_v42 }
0x110a   : > { %v3605_v25 = vmul.f32 -1.442695, %v2429_v23 }
0x110b   : > { %v2583_v14 = vpop.f32.mrb[28].mxu1  ;;  %v2659_v16 = vpop.f32.mrb[26].mxu0 }
0x110c   : > { %v3852_v17 = vpop.f32.mrb[27].mxu0  ;;  %2588 = vrot.lane.b32.xlu1 %v2583_v14, %s4099_s19  ;;  %v3847_v18 = vpop.f32.mrb[29].mxu1 }
0x1110   : > { %2507 = vrot.lane.b32.xlu1 %v2502_v11, %s4098_s18 }
0x1114   : > { %2664 = vrot.lane.b32.xlu1 %v2659_v16, %s4101_s30 }
0x117e   : > { %v2589_v20 = vpop.permute.xlu1 %2588 }
0x117f   : > { %v2591_v21 = vadd.f32 %v2589_v20, %v4298_v42 }
0x1181   : > { %4018 = vtanh.f32 %v2591_v21 }
0x1182   : > { %4020 = vpow2.f32 %v3605_v25  ;;  %v2508_v36 = vpop.permute.xlu1 %2507 }
0x1183   : > { %v2510_v34 = vadd.f32 %v2508_v36, %v4298_v42 }
0x1185   : > { %v3607_v37 = vmul.f32 -1.442695, %v2510_v34 }
0x1186   : > { %v2665_v49 = vpop.permute.xlu1 %2664 }
0x1187   : > { %v2667_v50 = vadd.f32 %v2665_v49, %v4298_v42 }
0x1189   : > { %v3610_v52 = vmul.f32 -1.442695, %v2667_v50 }
0x118b   : > { %v4019_v22 = vpop.eup %4018 }
0x118c   : > { %2676 = vrot.lane.b32.xlu0 %v4019_v22, %s4100_s20  ;;  %v4021_v26 = vpop.eup %4020 }
0x118d   : > { %v2433_v28 = vadd.f32 1.0, %v4021_v26 }
0x118f   : > { %4022 = vrcp.f32 %v2433_v28 }
0x1190   : > { %4024 = vpow2.f32 %v3607_v37 }
0x1199   : > { %v4023_v30 = vpop.eup %4022 }
0x119a   : > { %v4025_v38 = vpop.eup %4024 }
0x119b   : > { %v2514_v40 = vadd.f32 1.0, %v4025_v38 }
0x119d   : > { %4026 = vrcp.f32 %v2514_v40 }
0x11a7   : > { %v4027_v41 = vpop.eup %4026 }
0x11a8   : > { %v2674_v43 = vmul.f32 %v4027_v41, %v4450_v1 }
0x11fe   : > { %v2677_v31 = vpop.permute.xlu0 %2676 }
0x11ff   : > { %v2679_v33 = vmul.f32 %v4023_v30, %v2677_v31  ;;  %v4070_v30 = vld [vmem:[%s4582_s3 + $0x10] sm:$0xff] }
0x1201   : > { %2681 = vrot.lane.b32.xlu0 %v2679_v33, %s4098_s18 }
0x1273   : > { %v2682_v44 = vpop.permute.xlu0 %2681 }
0x1274   : > { %v4485_v46 = vadd.f32 %v2682_v44, %v2674_v43 }
0x1276   : > { %4028 = vtanh.f32 %v4485_v46 }
0x1277   : > { %4030 = vpow2.f32 %v3610_v52 }
0x1280   : > { %v4029_v47 = vpop.eup %4028 }
0x1281   : > { %2687 = vrot.lane.b32.xlu0 %v4029_v47, %s4099_s19  ;;  %v4031_v53 = vpop.eup %4030 }
0x1282   : > { %v2671_v54 = vadd.f32 1.0, %v4031_v53 }
0x1284   : > { %4032 = vrcp.f32 %v2671_v54 }
0x128e   : > { %v4033_v55 = vpop.eup %4032 }
0x12f3   : > { %v2688_v56 = vpop.permute.xlu0 %2687 }
0x12f4   : > { %v2690_v39 = vmul.f32 %v4033_v55, %v2688_v56 }
0x12f6   : > { %2692 = vrot.lane.b32.xlu1 %v2690_v39, %s4102_s21 }
0x1368   : > { %v2693_v57 = vpop.permute.xlu1 %2692 }
0x1369   : > { %3856 = vmatmul.mubr.msk.f32.vlgmr.msra.gmra.mrb[30].mxu1 %vm664_vm4, %v2693_v57  ;;  %3861 = vmatmul.mubr.msk.f32.vlgmr.msra.gmra.mrb[28].mxu0 %vm664_vm4, %v2693_v57 }
0x136a   : > { %3864 = vmatpush3.msra.mxu1 %v4217_v19  ;;  %3865 = vmatprep.mubr.msk.f32.mxu1 %vm4097_vm2, %v4096_v15 }
0x136b   : > { %3869 = vmatpush3.msra.mxu0 %v4267_v29  ;;  %3870 = vmatprep.mubr.msk.f32.mxu0 %vm4097_vm2, %v4096_v15 }
0x136c   : > { %3873 = vmatprep.subr.mxu1 %v4096_v15  ;;  %3878 = vmatprep.subr.mxu0 %v4096_v15 }
0x136d   : > { %3866 = vmatmul.mubr.msk.f32.vlgmr.msra.gmra.mrb[32].mxu1 %vm664_vm4, %v2693_v57  ;;  %3871 = vmatmul.mubr.msk.f32.vlgmr.msra.gmra.mrb[30].mxu0 %vm664_vm4, %v2693_v57 }
0x136e   : > { %3874 = vmatpush3.msra.mxu1 %v4240_v24  ;;  %3875 = vmatprep.mubr.msk.f32.mxu1 %vm4097_vm2, %v4096_v15 }
0x136f   : > { %3879 = vmatpush3.msra.mxu0 %v4254_v27  ;;  %3880 = vmatprep.mubr.msk.f32.mxu0 %vm4097_vm2, %v4096_v15 }
0x1370   : > { %3883 = vmatprep.subr.mxu1 %v4096_v15  ;;  %3888 = vmatprep.subr.mxu0 %v4096_v15 }
0x143c   : > { %v2762_v19 = vpop.f32.mrb[30].mxu1  ;;  %v2839_v42 = vpop.f32.mrb[28].mxu0 }
0x143d   : > { %v3857_v58 = vpop.f32.mrb[31].mxu1  ;;  %v3862_v59 = vpop.f32.mrb[29].mxu0  ;;  %v2766_v1 = vadd.f32 %v2762_v19, %v4305_v51 }
0x143e   : > { %v3365_v59 = vld [vmem:[%s4586_s7] sm:$0xff] }
0x143f   : > { %v3612_v2 = vmul.f32 -1.442695, %v2766_v1 }
0x1440   : > { %v2920_v60 = vpop.f32.mrb[32].mxu1  ;;  %v2996_v61 = vpop.f32.mrb[30].mxu0 }
0x1441   : > { %v3872_v62 = vpop.f32.mrb[31].mxu0  ;;  %2925 = vrot.lane.b32.xlu0 %v2920_v60, %s4099_s19  ;;  %v3867_v24 = vpop.f32.mrb[33].mxu1 }
0x1445   : > { %2844 = vrot.lane.b32.xlu0 %v2839_v42, %s4098_s18 }
0x1449   : > { %3001 = vrot.lane.b32.xlu0 %v2996_v61, %s4101_s30  ;;  %v3558_v61 = vld [vmem:[%s4585_s6] ss:$0 sm:$0xff] }
0x144a   : > { %v510_v62 = vadd.f32 %v3558_v61, %v4292_v35 }
0x14b3   : > { %v2926_v27 = vpop.permute.xlu0 %2925 }
0x14b4   : > { %v2928_v63 = vadd.f32 %v2926_v27, %v4305_v51 }
0x14b6   : > { %4034 = vtanh.f32 %v2928_v63 }
0x14b7   : > { %4036 = vpow2.f32 %v3612_v2  ;;  %v2845_v32 = vpop.permute.xlu0 %2844 }
0x14b8   : > { %v2847_v8 = vadd.f32 %v2845_v32, %v4305_v51 }
0x14ba   : > { %v3614_v9 = vmul.f32 -1.442695, %v2847_v8 }
0x14bb   : > { %v3002_v17 = vpop.permute.xlu0 %3001 }
0x14bc   : > { %v3004_v18 = vadd.f32 %v3002_v17, %v4305_v51 }
0x14be   : > { %v3617_v20 = vmul.f32 -1.442695, %v3004_v18 }
0x14c0   : > { %v4035_v0 = vpop.eup %4034 }
0x14c1   : > { %3013 = vrot.lane.b32.xlu1 %v4035_v0, %s4100_s20  ;;  %v4037_v3 = vpop.eup %4036 }
0x14c2   : > { %v2770_v4 = vadd.f32 1.0, %v4037_v3 }
0x14c4   : > { %4038 = vrcp.f32 %v2770_v4 }
0x14c5   : > { %4040 = vpow2.f32 %v3614_v9 }
0x14ce   : > { %v4039_v5 = vpop.eup %4038 }
0x14cf   : > { %v4041_v10 = vpop.eup %4040 }
0x14d0   : > { %v2851_v45 = vadd.f32 1.0, %v4041_v10 }
0x14d2   : > { %4042 = vrcp.f32 %v2851_v45 }
0x14dc   : > { %v4043_v11 = vpop.eup %4042 }
0x14dd   : > { %v3011_v12 = vmul.f32 %v4043_v11, %v4485_v46 }
0x1533   : > { %v3014_v6 = vpop.permute.xlu1 %3013 }
0x1534   : > { %v3016_v7 = vmul.f32 %v4039_v5, %v3014_v6 }
0x1536   : > { %3018 = vrot.lane.b32.xlu1 %v3016_v7, %s4098_s18 }
0x15a8   : > { %v3019_v13 = vpop.permute.xlu1 %3018 }
0x15a9   : > { %v3021_v14 = vadd.f32 %v3019_v13, %v3011_v12 }
0x15ab   : > { %4044 = vtanh.f32 %v3021_v14 }
0x15ac   : > { %4046 = vpow2.f32 %v3617_v20 }
0x15b5   : > { %v4045_v16 = vpop.eup %4044 }
0x15b6   : > { %3024 = vrot.lane.b32.xlu1 %v4045_v16, %s4099_s19  ;;  %v4047_v21 = vpop.eup %4046 }
0x15b7   : > { %v3008_v22 = vadd.f32 1.0, %v4047_v21 }
0x15b9   : > { %4048 = vrcp.f32 %v3008_v22 }
0x15c3   : > { %v4049_v23 = vpop.eup %4048 }
0x1628   : > { %v3025_v25 = vpop.permute.xlu1 %3024 }
0x1629   : > { %v3027_v26 = vmul.f32 %v4049_v23, %v3025_v25 }
0x162b   : > { %3029 = vrot.lane.b32.xlu0 %v3027_v26, %s4102_s21 }
0x169d   : > { %v3030_v28 = vpop.permute.xlu0 %3029 }
0x169e   : > { %3876 = vmatmul.mubr.msk.f32.vlgmr.msra.gmra.mrb[34].mxu1 %vm664_vm4, %v3030_v28  ;;  %3881 = vmatmul.mubr.msk.f32.vlgmr.msra.gmra.mrb[32].mxu0 %vm664_vm4, %v3030_v28 }
0x169f   : > { %3884 = vmatpush3.msra.mxu1 %v4070_v30  ;;  %3885 = vmatprep.mubr.msk.f32.mxu1 %vm4097_vm2, %v4096_v15 }
0x16a0   : > { %3889 = vmatpush3.msra.mxu0 %v4267_v29  ;;  %3890 = vmatprep.mubr.msk.f32.mxu0 %vm4097_vm2, %v4096_v15 }
0x16a1   : > { %3893 = vmatprep.subr.mxu1 %v4096_v15 }
0x16a2   : > { %3886 = vmatmul.mubr.msk.f32.vlgmr.msra.gmra.mrb[36].mxu1 %vm664_vm4, %v3030_v28  ;;  %3891 = vmatmul.mubr.msk.f32.vlgmr.msra.gmra.mrb[34].mxu0 %vm664_vm4, %v3030_v28 }
0x16a3   : > { %3895 = vmatprep.mubr.msk.f32.mxu1 %vm4097_vm2, %v4096_v15  ;;  %3894 = vmatpush3.msra.mxu1 %v3365_v59 }
0x1771   : > { %v3099_v51 = vpop.f32.mrb[34].mxu1  ;;  %v3176_v31 = vpop.f32.mrb[32].mxu0 }
0x1772   : > { %v3877_v33 = vpop.f32.mrb[35].mxu1  ;;  %v3882_v36 = vpop.f32.mrb[33].mxu0  ;;  %v3103_v15 = vadd.f32 %v3099_v51, %v4302_v48 }
0x1774   : > { %v3619_v44 = vmul.f32 -1.442695, %v3103_v15 }
0x1775   : > { %v3257_v34 = vpop.f32.mrb[36].mxu1  ;;  %v3333_v37 = vpop.f32.mrb[34].mxu0 }
0x1776   : > { %v3892_v38 = vpop.f32.mrb[35].mxu0  ;;  %3262 = vrot.lane.b32.xlu1 %v3257_v34, %s4099_s19  ;;  %v3887_v29 = vpop.f32.mrb[37].mxu1 }
0x177a   : > { %3181 = vrot.lane.b32.xlu1 %v3176_v31, %s4098_s18 }
0x177e   : > { %3338 = vrot.lane.b32.xlu1 %v3333_v37, %s4101_s30 }
0x17e8   : > { %v3263_v40 = vpop.permute.xlu1 %3262 }
0x17e9   : > { %v3265_v41 = vadd.f32 %v3263_v40, %v4302_v48 }
0x17eb   : > { %4050 = vtanh.f32 %v3265_v41 }
0x17ec   : > { %4052 = vpow2.f32 %v3619_v44  ;;  %v3182_v53 = vpop.permute.xlu1 %3181 }
0x17ed   : > { %v3184_v54 = vadd.f32 %v3182_v53, %v4302_v48 }
0x17ef   : > { %v3621_v55 = vmul.f32 -1.442695, %v3184_v54 }
0x17f0   : > { %v3339_v24 = vpop.permute.xlu1 %3338 }
0x17f1   : > { %v3341_v27 = vadd.f32 %v3339_v24, %v4302_v48  ;;  %v3445_v48 = vld [vmem:[%s422_s14] sm:$0xff] }
0x17f3   : > { %v3624_v63 = vmul.f32 -1.442695, %v3341_v27 }
0x17f5   : > { %v4051_v43 = vpop.eup %4050 }
0x17f6   : > { %3350 = vrot.lane.b32.xlu0 %v4051_v43, %s4100_s20  ;;  %v4053_v46 = vpop.eup %4052 }
0x17f7   : > { %v3107_v47 = vadd.f32 1.0, %v4053_v46 }
0x17f9   : > { %4054 = vrcp.f32 %v3107_v47 }
0x17fa   : > { %4056 = vpow2.f32 %v3621_v55 }
0x1803   : > { %v4055_v49 = vpop.eup %4054 }
0x1804   : > { %v4057_v56 = vpop.eup %4056 }
0x1805   : > { %v3188_v39 = vadd.f32 1.0, %v4057_v56 }
0x1807   : > { %4058 = vrcp.f32 %v3188_v39 }
0x1811   : > { %v4059_v57 = vpop.eup %4058 }
0x1812   : > { %v3348_v19 = vmul.f32 %v4059_v57, %v3021_v14 }
0x1868   : > { %v3351_v50 = vpop.permute.xlu0 %3350 }
0x1869   : > { %v3353_v52 = vmul.f32 %v4055_v49, %v3351_v50 }
0x186b   : > { %3355 = vrot.lane.b32.xlu0 %v3353_v52, %s4098_s18 }
0x18dd   : > { %v3356_v42 = vpop.permute.xlu0 %3355 }
0x18de   : > { %v3358_v58 = vadd.f32 %v3356_v42, %v3348_v19 }
0x18e0   : > { %4060 = vtanh.f32 %v3358_v58 }
0x18e1   : > { %4062 = vpow2.f32 %v3624_v63 }
0x18ea   : > { %v4061_v60 = vpop.eup %4060 }
0x18eb   : > { %3361 = vrot.lane.b32.xlu0 %v4061_v60, %s4099_s19  ;;  %v4063_v0 = vpop.eup %4062  ;;  %s426_s19 = scalar_lea.vmem %s4588_s9, %s4226_s23 }
0x18ec   : > { %v3345_v1 = vadd.f32 1.0, %v4063_v0 }
0x18ee   : > { %4064 = vrcp.f32 %v3345_v1 }
0x18ef   : > { %3370 = vrot.lane.b32.xlu0 %v510_v62, %s4103_s27 }
0x18f8   : > { %v4065_v2 = vpop.eup %4064 }
0x195d   : > { %v3362_v3 = vpop.permute.xlu0 %3361 }
0x195e   : > { %v3364_v4 = vmul.f32 %v4065_v2, %v3362_v3 }
0x1960   : > { %3367 = vrot.lane.b32.xlu1 %v3364_v4, %s4102_s21 }
0x1961   : > { %v3371_v35 = vpop.permute.xlu0 %3370 }
0x19d2   : > { %v3368_v5 = vpop.permute.xlu1 %3367 }
0x19d3   : > { %3896 = vmatmul.mubr.msk.f32.vlgmr.msra.gmra.mrb[38].mxu1 %vm664_vm4, %v3368_v5 }
0x1aa6   : > { %v3441_v6 = vpop.f32.mrb[38].mxu1 }
0x1aa7   : > { %v3442_v7 = vadd.f32 %v3441_v6, %v3371_v35  ;;  %v3897_v32 = vpop.f32.mrb[39].mxu1 }
0x1aa9   : > { %v3446_v8 = vadd.f32 %v3445_v48, %v3442_v7 }
0x1aab   : > { %v3447_v9 = vsel %vm529_vm1, %v3446_v8, -inf }
0x1aac   : > { %3448 = vmax.xlane.f32.xlu1 %v3447_v9 }
0x1b39   : > { %v3449_v10 = vpop.xlane.xlu1 %3448 }
0x1b3a   : > { %v3450_v45 = vsub.f32 %v3446_v8, %v3449_v10 }
0x1b3c   : > { %v3451_v11 = vmul.f32 1.442695, %v3450_v45 }
0x1b3e   : > { %4066 = vpow2.f32 %v3451_v11 }
0x1b48   : > { %v4067_v12 = vpop.eup %4066 }
0x1b49   : > { %v3453_v13 = vsel %vm529_vm1, %v4067_v12, 0.0 }
0x1b4a   : > { %3454 = vadd.xlane.f32.xlu0 %v3453_v13 }
0x1bd7   : > { %v3455_v14 = vpop.xlane.xlu0 %3454 }
0x1bd8   : > { %4068 = vrcp.f32 %v3455_v14 }
0x1be2   : > { %v4069_v16 = vpop.eup %4068 }
0x1be3   : > { %v3457_v17 = vmul.f32 %v4069_v16, %v4067_v12 }
0x1be5   : > { %3459 = vrot.lane.b32.xlu0 %v3457_v17, %s4104_s15 }
0x1c57   : > { %v3460_v18 = vpop.permute.xlu0 %3459 }
0x1c58   : > { %v3462_v20 = vsel %vm529_vm1, %v510_v62, %v3460_v18 }
0x1c59   : > { %3463 = vst.msk [vmem:[%s426_s19] sm:$0xff] %vm664_vm4, %v3462_v20 }
0x1c5a PF: > { %p16_p9 = scmp.ge.s32.totalorder %s4172_s13, 4   ;;  %s4589_s30 = smov %s4089_s10 }
0x1c5b   : > { %s4590_s10 = smov %s4181_s16  ;;  %s4591_s11 = smov %s4172_s13 }
0x1c5c   :  { %18 = sbr.rel (!%p16_p9) target bundleno = 2 (0x2), region = 138 }

</bundles_post_ra>
